<compile_context>
chip_gen: v6e
topology: v6e:2x2x1
jax: 0.10.0
libtpu: 0.0.40
codegen_flags: <defaults>
</compile_context>

<pallas_src>
import jax
import jax.numpy as jnp
import numpy as np
from jax.experimental import pallas as pl
from jax.experimental.pallas import tpu as pltpu


def decoder_lstm_kernel(x_ref, h0_ref, c0_ref,
                        wih0_ref, b0_ref, brest_ref, whhblk_ref,
                        w1_ref, b1_ref, w2_ref, b2_ref,
                        seq_out_ref, state_ref):
    L, I = x_ref.shape
    NL, H = h0_ref.shape
    G = 4 * H
    S = L + NL - 1                      # number of wavefront steps

    # Hoisted, batched input->hidden matmul for layer 0 (bias folded in),
    # off the recurrent critical path.
    xg = jnp.dot(x_ref[...], wih0_ref[...],
                 preferred_element_type=jnp.float32) + b0_ref[...]      # (L, G)

    # Per-wavefront-step additive slab: column block 0 = layer-0 x-gates,
    # column block l>=1 = that layer's (time-constant) bias.
    if NL > 1:
        xg_pad = jnp.concatenate(
            [xg, jnp.zeros((NL - 1, G), jnp.float32)], axis=0)          # (S, G)
        cols = [xg_pad]
        for l in range(1, NL):
            cols.append(jnp.broadcast_to(brest_ref[pl.ds(l - 1, 1), :], (S, G)))
        add_full = jnp.concatenate(cols, axis=1)                        # (S, NL*G)
    else:
        add_full = xg

    # Loop-invariant weights kept resident as values across the unrolled loop.
    whh_blk = whhblk_ref[...]           # (NL*H, NL*G) bf16 block-diagonal RHS
    w1 = w1_ref[...]; b1 = b1_ref[...]
    w2 = w2_ref[...]; b2 = b2_ref[...]

    # h/c carried as values (vregs); no VMEM scratch.
    h = [h0_ref[pl.ds(l, 1), :] for l in range(NL)]
    c = [c0_ref[pl.ds(l, 1), :] for l in range(NL)]

    for s in range(S):                  # static -> fully unrolled wavefront
        # Snapshot of all layers' current hidden states (layer l reads layer
        # l-1's output for the SAME timestep via this snapshot).
        h_cat = jnp.concatenate(h, axis=1) if NL > 1 else h[0]          # (1, NL*H)
        rec = jnp.dot(h_cat.astype(jnp.bfloat16), whh_blk,
                      preferred_element_type=jnp.float32)                # (1, NL*G)
        gates = rec + add_full[s:s + 1, :]
        # Single sigmoid over every layer's gates; g recovered via the exact
        # identity tanh(x) = 2*sigmoid(2x) - 1 (g columns pre-scaled by 2).
        sg = jax.nn.sigmoid(gates)
        for l in range(NL):
            t = s - l
            if not (0 <= t < L):
                continue                # layer inactive at this wavefront step
            base = l * G
            i_g = sg[:, base:base + H]
            f_g = sg[:, base + H:base + 2 * H]
            g_g = 2.0 * sg[:, base + 2 * H:base + 3 * H] - 1.0
            o_g = sg[:, base + 3 * H:base + 4 * H]
            c[l] = f_g * c[l] + i_g * g_g
            h[l] = o_g * jnp.tanh(c[l])
            if l == NL - 1:
                # Per-row epilogue (linear_1 / linear_2): independent of the
                # recurrence, so its MXU pushes hide under the serial chain.
                dec_row = jnp.dot(h[l], w1,
                                  preferred_element_type=jnp.float32) + b1
                lay_row = jnp.dot(dec_row, w2,
                                  preferred_element_type=jnp.float32) + b2
                seq_out_ref[pl.ds(t, 1), :] = jnp.concatenate(
                    [dec_row, lay_row], axis=1)

    # Merged state writeback: rows [0:NL] = hn, rows [NL:2NL] = cn.
    for l in range(NL):
        state_ref[pl.ds(l, 1), :] = h[l]
        state_ref[pl.ds(NL + l, 1), :] = c[l]


def _prescale_g_cols(a, H, nblocks):
    """Scale the g-gate columns (2H:3H inside each 4H block) by 2 so the
    kernel can recover tanh(x) = 2*sigmoid(2x) - 1 from a single sigmoid."""
    parts = []
    for l in range(nblocks):
        blk = a[..., l * 4 * H:(l + 1) * 4 * H]
        parts.append(jnp.concatenate(
            [blk[..., :2 * H], 2.0 * blk[..., 2 * H:3 * H], blk[..., 3 * H:]],
            axis=-1))
    return jnp.concatenate(parts, axis=-1) if nblocks > 1 else parts[0]


def _build_block_diag_rhs(params, NL, H):
    """(NL*H, NL*4H) fused recurrent RHS: block (r, l) = Whh_l if r == l,
    Wih_l if r == l-1 (layer l's input is layer l-1's output), else 0."""
    G = 4 * H
    rows = []
    for r in range(NL):
        row_blocks = []
        for l in range(NL):
            if l == r:
                w = params["whh0"] if l == 0 else params["whhr"][l - 1]
            elif l == r + 1:
                w = params["wihr"][l - 1]
            else:
                w = jnp.zeros((H, G), jnp.float32)
            row_blocks.append(w)
        rows.append(jnp.concatenate(row_blocks, axis=1))
    return jnp.concatenate(rows, axis=0)


def decoder_lstm_forward(x, hn, cn, params):
    L, I = x.shape
    NL, H = hn.shape
    O = params["w2"].shape[1]

    # One-time weight preprocessing (done once at load time in real use):
    # fused block-diagonal recurrent RHS in bf16 + g-gate pre-scaling.
    whh_blk = _prescale_g_cols(_build_block_diag_rhs(params, NL, H), H, NL)
    whh_blk = whh_blk.astype(jnp.bfloat16)
    wih0 = _prescale_g_cols(params["wih0"], H, 1)
    b0 = _prescale_g_cols(params["b0"], H, 1)
    if NL > 1:
        brest = _prescale_g_cols(params["br"], H, 1)
    else:
        brest = jnp.zeros((1, 4 * H), jnp.float32)   # unused dummy

    vmem = pl.BlockSpec(memory_space=pltpu.MemorySpace.VMEM)
    out_shapes = (
        jax.ShapeDtypeStruct((L, I + O), jnp.float32),    # [dec | layer] rows
        jax.ShapeDtypeStruct((2 * NL, H), jnp.float32),   # [hn ; cn]
    )
    seq_out, state = pl.pallas_call(
        decoder_lstm_kernel,
        out_shape=out_shapes,
        in_specs=[vmem] * 11,
        out_specs=(vmem, vmem),
    )(x, hn, cn, wih0, b0, brest, whh_blk,
      params["w1"], params["b1"], params["w2"], params["b2"])

    dec_out = seq_out[:, :I]
    layer_out = seq_out[:, I:]
    return layer_out, dec_out, state[:NL], state[NL:]


def init_params(key, I, H, NL, O):
    ks = jax.random.split(key, 12)
    bound_l = 1.0 / np.sqrt(H)

    def u(k, shape, bound):
        return jax.random.uniform(k, shape, jnp.float32, -bound, bound)

    params = dict(
        wih0=u(ks[0], (I, 4 * H), bound_l),
        whh0=u(ks[1], (H, 4 * H), bound_l),
        b0=u(ks[2], (1, 4 * H), bound_l) + u(ks[3], (1, 4 * H), bound_l),
        wihr=u(ks[4], (NL - 1, H, 4 * H), bound_l),
        whhr=u(ks[5], (NL - 1, H, 4 * H), bound_l),
        br=u(ks[6], (NL - 1, 4 * H), bound_l) + u(ks[7], (NL - 1, 4 * H), bound_l),
        w1=u(ks[8], (H, I), 1.0 / np.sqrt(H)),
        b1=u(ks[9], (1, I), 1.0 / np.sqrt(H)),
        w2=u(ks[10], (I, O), 1.0 / np.sqrt(I)),
        b2=u(ks[11], (1, O), 1.0 / np.sqrt(I)),
    )
    return params


def reference_forward(x, h0, c0, p):
    """Pure-JAX f32 reference matching torch.nn.LSTM + two Linear layers."""
    L, _ = x.shape
    NL, H = h0.shape
    seq = x
    hs, cs = [], []
    for l in range(NL):
        wih = p["wih0"] if l == 0 else p["wihr"][l - 1]
        whh = p["whh0"] if l == 0 else p["whhr"][l - 1]
        b = p["b0"][0] if l == 0 else p["br"][l - 1]
        h, c = h0[l], c0[l]
        outs = []
        for t in range(L):
            gates = seq[t] @ wih + h @ whh + b
            i = jax.nn.sigmoid(gates[0:H])
            f = jax.nn.sigmoid(gates[H:2 * H])
            g = jnp.tanh(gates[2 * H:3 * H])
            o = jax.nn.sigmoid(gates[3 * H:4 * H])
            c = f * c + i * g
            h = o * jnp.tanh(c)
            outs.append(h)
        seq = jnp.stack(outs)
        hs.append(h)
        cs.append(c)
    dec = seq @ p["w1"] + p["b1"][0]
    out = dec @ p["w2"] + p["b2"][0]
    return out, dec, jnp.stack(hs), jnp.stack(cs)


if __name__ == "__main__":
    # lstm_input_dim=16, lstm_hidden_dim=32, lstm_num_layer=2, lstm_output_dim=8
    L, I, H, NL, O = 8, 16, 32, 2, 8
    key = jax.random.PRNGKey(0)
    kx, kh, kc, kp = jax.random.split(key, 4)
    x = jax.random.normal(kx, (L, I), jnp.float32)
    h0 = jax.random.normal(kh, (NL, H), jnp.float32)
    c0 = jax.random.normal(kc, (NL, H), jnp.float32)
    params = init_params(kp, I, H, NL, O)

    outs = decoder_lstm_forward(x, h0, c0, params)
    outs = jax.block_until_ready(outs)

    refs = reference_forward(x, h0, c0, params)
    # The recurrent matmul uses bf16 weights/LHS on the MXU (per perf review),
    # so compare against the exact f32 reference with a relaxed tolerance.
    for got, want in zip(outs, refs):
        np.testing.assert_allclose(np.asarray(got), np.asarray(want),
                                   rtol=3e-2, atol=3e-2)
    print("KERNEL_OK")
</pallas_src>

<mosaic_0001>
module attributes {stable_mosaic.version = 11 : i64} {
  func.func @decoder_lstm_kernel(%arg0: memref<8x16xf32, #tpu.memory_space<vmem>>, %arg1: memref<2x32xf32, #tpu.memory_space<vmem>>, %arg2: memref<2x32xf32, #tpu.memory_space<vmem>>, %arg3: memref<16x128xf32, #tpu.memory_space<vmem>>, %arg4: memref<1x128xf32, #tpu.memory_space<vmem>>, %arg5: memref<1x128xf32, #tpu.memory_space<vmem>>, %arg6: memref<64x256xbf16, #tpu.memory_space<vmem>>, %arg7: memref<32x16xf32, #tpu.memory_space<vmem>>, %arg8: memref<1x16xf32, #tpu.memory_space<vmem>>, %arg9: memref<16x8xf32, #tpu.memory_space<vmem>>, %arg10: memref<1x8xf32, #tpu.memory_space<vmem>>, %arg11: memref<8x24xf32, #tpu.memory_space<vmem>>, %arg12: memref<4x32xf32, #tpu.memory_space<vmem>>) attributes {dimension_semantics = [], scalar_prefetch = 0 : i64, scratch_operands = 0 : i64, tpu.core_type = #tpu.core_type<tc>} {
    %c0 = arith.constant 0 : index
    %c0_0 = arith.constant 0 : index
    %0 = vector.load %arg0[%c0, %c0_0] : memref<8x16xf32, #tpu.memory_space<vmem>>, vector<8x16xf32>
    %c0_1 = arith.constant 0 : index
    %c0_2 = arith.constant 0 : index
    %1 = vector.load %arg3[%c0_1, %c0_2] : memref<16x128xf32, #tpu.memory_space<vmem>>, vector<16x128xf32>
    %cst = arith.constant dense<0.000000e+00> : vector<8x128xf32>
    %2 = tpu.matmul %0, %1, %cst {dimension_numbers = #tpu.dot_dimension_numbers<[1], [0], [0], [1], [0, 0, 1, 1], [], []>} : vector<8x16xf32>, vector<16x128xf32>, vector<8x128xf32> -> vector<8x128xf32>
    %c0_3 = arith.constant 0 : index
    %c0_4 = arith.constant 0 : index
    %3 = vector.load %arg4[%c0_3, %c0_4] : memref<1x128xf32, #tpu.memory_space<vmem>>, vector<1x128xf32>
    %4 = vector.broadcast %3 : vector<1x128xf32> to vector<8x128xf32>
    %5 = arith.addf %2, %4 : vector<8x128xf32>
    %cst_5 = arith.constant 0.000000e+00 : f32
    %6 = vector.broadcast %cst_5 : f32 to vector<1x128xf32>
    %7 = tpu.concatenate %5, %6 in 0 : vector<8x128xf32>, vector<1x128xf32> -> vector<9x128xf32>
    %c0_6 = arith.constant 0 : index
    %c0_7 = arith.constant 0 : index
    %8 = vector.load %arg5[%c0_6, %c0_7] : memref<1x128xf32, #tpu.memory_space<vmem>>, vector<1x128xf32>
    %9 = vector.shape_cast %8 : vector<1x128xf32> to vector<1x128xf32>
    %10 = vector.broadcast %9 : vector<1x128xf32> to vector<9x128xf32>
    %11 = tpu.concatenate %7, %10 in 1 : vector<9x128xf32>, vector<9x128xf32> -> vector<9x256xf32>
    %c0_8 = arith.constant 0 : index
    %c0_9 = arith.constant 0 : index
    %12 = vector.load %arg6[%c0_8, %c0_9] : memref<64x256xbf16, #tpu.memory_space<vmem>>, vector<64x256xbf16>
    %c0_10 = arith.constant 0 : index
    %c0_11 = arith.constant 0 : index
    %13 = vector.load %arg7[%c0_10, %c0_11] : memref<32x16xf32, #tpu.memory_space<vmem>>, vector<32x16xf32>
    %c0_12 = arith.constant 0 : index
    %c0_13 = arith.constant 0 : index
    %14 = vector.load %arg8[%c0_12, %c0_13] : memref<1x16xf32, #tpu.memory_space<vmem>>, vector<1x16xf32>
    %c0_14 = arith.constant 0 : index
    %c0_15 = arith.constant 0 : index
    %15 = vector.load %arg9[%c0_14, %c0_15] : memref<16x8xf32, #tpu.memory_space<vmem>>, vector<16x8xf32>
    %c0_16 = arith.constant 0 : index
    %c0_17 = arith.constant 0 : index
    %16 = vector.load %arg10[%c0_16, %c0_17] : memref<1x8xf32, #tpu.memory_space<vmem>>, vector<1x8xf32>
    %c0_18 = arith.constant 0 : index
    %c0_19 = arith.constant 0 : index
    %17 = vector.load %arg1[%c0_18, %c0_19] : memref<2x32xf32, #tpu.memory_space<vmem>>, vector<1x32xf32>
    %c1 = arith.constant 1 : index
    %c0_20 = arith.constant 0 : index
    %18 = vector.load %arg1[%c1, %c0_20] : memref<2x32xf32, #tpu.memory_space<vmem>>, vector<1x32xf32>
    %c0_21 = arith.constant 0 : index
    %c0_22 = arith.constant 0 : index
    %19 = vector.load %arg2[%c0_21, %c0_22] : memref<2x32xf32, #tpu.memory_space<vmem>>, vector<1x32xf32>
    %c1_23 = arith.constant 1 : index
    %c0_24 = arith.constant 0 : index
    %20 = vector.load %arg2[%c1_23, %c0_24] : memref<2x32xf32, #tpu.memory_space<vmem>>, vector<1x32xf32>
    %21 = tpu.concatenate %17, %18 in 1 : vector<1x32xf32>, vector<1x32xf32> -> vector<1x64xf32>
    %22 = arith.truncf %21 : vector<1x64xf32> to vector<1x64xbf16>
    %cst_25 = arith.constant dense<0.000000e+00> : vector<1x256xf32>
    %23 = tpu.matmul %22, %12, %cst_25 {dimension_numbers = #tpu.dot_dimension_numbers<[1], [0], [0], [1], [0, 0, 1, 1], [], []>} : vector<1x64xbf16>, vector<64x256xbf16>, vector<1x256xf32> -> vector<1x256xf32>
    %24 = vector.extract_strided_slice %11 {offsets = [0, 0], sizes = [1, 256], strides = [1, 1]} : vector<9x256xf32> to vector<1x256xf32>
    %25 = arith.addf %23, %24 : vector<1x256xf32>
    %26 = arith.negf %25 : vector<1x256xf32>
    %27 = math.exp %26 : vector<1x256xf32>
    %cst_26 = arith.constant 1.000000e+00 : f32
    %28 = vector.broadcast %cst_26 : f32 to vector<1x256xf32>
    %29 = arith.addf %28, %27 : vector<1x256xf32>
    %30 = arith.divf %28, %29 : vector<1x256xf32>
    %31 = vector.extract_strided_slice %30 {offsets = [0, 0], sizes = [1, 32], strides = [1, 1]} : vector<1x256xf32> to vector<1x32xf32>
    %32 = vector.extract_strided_slice %30 {offsets = [0, 32], sizes = [1, 32], strides = [1, 1]} : vector<1x256xf32> to vector<1x32xf32>
    %33 = vector.extract_strided_slice %30 {offsets = [0, 64], sizes = [1, 32], strides = [1, 1]} : vector<1x256xf32> to vector<1x32xf32>
    %cst_27 = arith.constant 2.000000e+00 : f32
    %34 = vector.broadcast %cst_27 : f32 to vector<1x32xf32>
    %35 = arith.mulf %34, %33 : vector<1x32xf32>
    %cst_28 = arith.constant 1.000000e+00 : f32
    %36 = vector.broadcast %cst_28 : f32 to vector<1x32xf32>
    %37 = arith.subf %35, %36 : vector<1x32xf32>
    %38 = vector.extract_strided_slice %30 {offsets = [0, 96], sizes = [1, 32], strides = [1, 1]} : vector<1x256xf32> to vector<1x32xf32>
    %39 = arith.mulf %32, %19 : vector<1x32xf32>
    %40 = arith.mulf %31, %37 : vector<1x32xf32>
    %41 = arith.addf %39, %40 : vector<1x32xf32>
    %42 = math.tanh %41 : vector<1x32xf32>
    %43 = arith.mulf %38, %42 : vector<1x32xf32>
    %44 = tpu.concatenate %43, %18 in 1 : vector<1x32xf32>, vector<1x32xf32> -> vector<1x64xf32>
    %45 = arith.truncf %44 : vector<1x64xf32> to vector<1x64xbf16>
    %cst_29 = arith.constant dense<0.000000e+00> : vector<1x256xf32>
    %46 = tpu.matmul %45, %12, %cst_29 {dimension_numbers = #tpu.dot_dimension_numbers<[1], [0], [0], [1], [0, 0, 1, 1], [], []>} : vector<1x64xbf16>, vector<64x256xbf16>, vector<1x256xf32> -> vector<1x256xf32>
    %47 = vector.extract_strided_slice %11 {offsets = [1, 0], sizes = [1, 256], strides = [1, 1]} : vector<9x256xf32> to vector<1x256xf32>
    %48 = arith.addf %46, %47 : vector<1x256xf32>
    %49 = arith.negf %48 : vector<1x256xf32>
    %50 = math.exp %49 : vector<1x256xf32>
    %cst_30 = arith.constant 1.000000e+00 : f32
    %51 = vector.broadcast %cst_30 : f32 to vector<1x256xf32>
    %52 = arith.addf %51, %50 : vector<1x256xf32>
    %53 = arith.divf %51, %52 : vector<1x256xf32>
    %54 = vector.extract_strided_slice %53 {offsets = [0, 0], sizes = [1, 32], strides = [1, 1]} : vector<1x256xf32> to vector<1x32xf32>
    %55 = vector.extract_strided_slice %53 {offsets = [0, 32], sizes = [1, 32], strides = [1, 1]} : vector<1x256xf32> to vector<1x32xf32>
    %56 = vector.extract_strided_slice %53 {offsets = [0, 64], sizes = [1, 32], strides = [1, 1]} : vector<1x256xf32> to vector<1x32xf32>
    %cst_31 = arith.constant 2.000000e+00 : f32
    %57 = vector.broadcast %cst_31 : f32 to vector<1x32xf32>
    %58 = arith.mulf %57, %56 : vector<1x32xf32>
    %cst_32 = arith.constant 1.000000e+00 : f32
    %59 = vector.broadcast %cst_32 : f32 to vector<1x32xf32>
    %60 = arith.subf %58, %59 : vector<1x32xf32>
    %61 = vector.extract_strided_slice %53 {offsets = [0, 96], sizes = [1, 32], strides = [1, 1]} : vector<1x256xf32> to vector<1x32xf32>
    %62 = arith.mulf %55, %41 : vector<1x32xf32>
    %63 = arith.mulf %54, %60 : vector<1x32xf32>
    %64 = arith.addf %62, %63 : vector<1x32xf32>
    %65 = math.tanh %64 : vector<1x32xf32>
    %66 = arith.mulf %61, %65 : vector<1x32xf32>
    %67 = vector.extract_strided_slice %53 {offsets = [0, 128], sizes = [1, 32], strides = [1, 1]} : vector<1x256xf32> to vector<1x32xf32>
    %68 = vector.extract_strided_slice %53 {offsets = [0, 160], sizes = [1, 32], strides = [1, 1]} : vector<1x256xf32> to vector<1x32xf32>
    %69 = vector.extract_strided_slice %53 {offsets = [0, 192], sizes = [1, 32], strides = [1, 1]} : vector<1x256xf32> to vector<1x32xf32>
    %cst_33 = arith.constant 2.000000e+00 : f32
    %70 = vector.broadcast %cst_33 : f32 to vector<1x32xf32>
    %71 = arith.mulf %70, %69 : vector<1x32xf32>
    %cst_34 = arith.constant 1.000000e+00 : f32
    %72 = vector.broadcast %cst_34 : f32 to vector<1x32xf32>
    %73 = arith.subf %71, %72 : vector<1x32xf32>
    %74 = vector.extract_strided_slice %53 {offsets = [0, 224], sizes = [1, 32], strides = [1, 1]} : vector<1x256xf32> to vector<1x32xf32>
    %75 = arith.mulf %68, %20 : vector<1x32xf32>
    %76 = arith.mulf %67, %73 : vector<1x32xf32>
    %77 = arith.addf %75, %76 : vector<1x32xf32>
    %78 = math.tanh %77 : vector<1x32xf32>
    %79 = arith.mulf %74, %78 : vector<1x32xf32>
    %cst_35 = arith.constant dense<0.000000e+00> : vector<1x16xf32>
    %80 = tpu.matmul %79, %13, %cst_35 {dimension_numbers = #tpu.dot_dimension_numbers<[1], [0], [0], [1], [0, 0, 1, 1], [], []>} : vector<1x32xf32>, vector<32x16xf32>, vector<1x16xf32> -> vector<1x16xf32>
    %81 = arith.addf %80, %14 : vector<1x16xf32>
    %cst_36 = arith.constant dense<0.000000e+00> : vector<1x8xf32>
    %82 = tpu.matmul %81, %15, %cst_36 {dimension_numbers = #tpu.dot_dimension_numbers<[1], [0], [0], [1], [0, 0, 1, 1], [], []>} : vector<1x16xf32>, vector<16x8xf32>, vector<1x8xf32> -> vector<1x8xf32>
    %83 = arith.addf %82, %16 : vector<1x8xf32>
    %84 = tpu.concatenate %81, %83 in 1 : vector<1x16xf32>, vector<1x8xf32> -> vector<1x24xf32>
    %c0_37 = arith.constant 0 : index
    %c0_38 = arith.constant 0 : index
    %85 = vector.load %arg11[%c0_37, %c0_38] : memref<8x24xf32, #tpu.memory_space<vmem>>, vector<1x24xf32>
    tpu.vector_store %arg11[%c0_37, %c0_38], %84 {strides = array<i32>} : memref<8x24xf32, #tpu.memory_space<vmem>>, vector<1x24xf32>,
    %86 = tpu.concatenate %66, %79 in 1 : vector<1x32xf32>, vector<1x32xf32> -> vector<1x64xf32>
    %87 = arith.truncf %86 : vector<1x64xf32> to vector<1x64xbf16>
    %cst_39 = arith.constant dense<0.000000e+00> : vector<1x256xf32>
    %88 = tpu.matmul %87, %12, %cst_39 {dimension_numbers = #tpu.dot_dimension_numbers<[1], [0], [0], [1], [0, 0, 1, 1], [], []>} : vector<1x64xbf16>, vector<64x256xbf16>, vector<1x256xf32> -> vector<1x256xf32>
    %89 = vector.extract_strided_slice %11 {offsets = [2, 0], sizes = [1, 256], strides = [1, 1]} : vector<9x256xf32> to vector<1x256xf32>
    %90 = arith.addf %88, %89 : vector<1x256xf32>
    %91 = arith.negf %90 : vector<1x256xf32>
    %92 = math.exp %91 : vector<1x256xf32>
    %cst_40 = arith.constant 1.000000e+00 : f32
    %93 = vector.broadcast %cst_40 : f32 to vector<1x256xf32>
    %94 = arith.addf %93, %92 : vector<1x256xf32>
    %95 = arith.divf %93, %94 : vector<1x256xf32>
    %96 = vector.extract_strided_slice %95 {offsets = [0, 0], sizes = [1, 32], strides = [1, 1]} : vector<1x256xf32> to vector<1x32xf32>
    %97 = vector.extract_strided_slice %95 {offsets = [0, 32], sizes = [1, 32], strides = [1, 1]} : vector<1x256xf32> to vector<1x32xf32>
    %98 = vector.extract_strided_slice %95 {offsets = [0, 64], sizes = [1, 32], strides = [1, 1]} : vector<1x256xf32> to vector<1x32xf32>
    %cst_41 = arith.constant 2.000000e+00 : f32
    %99 = vector.broadcast %cst_41 : f32 to vector<1x32xf32>
    %100 = arith.mulf %99, %98 : vector<1x32xf32>
    %cst_42 = arith.constant 1.000000e+00 : f32
    %101 = vector.broadcast %cst_42 : f32 to vector<1x32xf32>
    %102 = arith.subf %100, %101 : vector<1x32xf32>
    %103 = vector.extract_strided_slice %95 {offsets = [0, 96], sizes = [1, 32], strides = [1, 1]} : vector<1x256xf32> to vector<1x32xf32>
    %104 = arith.mulf %97, %64 : vector<1x32xf32>
    %105 = arith.mulf %96, %102 : vector<1x32xf32>
    %106 = arith.addf %104, %105 : vector<1x32xf32>
    %107 = math.tanh %106 : vector<1x32xf32>
    %108 = arith.mulf %103, %107 : vector<1x32xf32>
    %109 = vector.extract_strided_slice %95 {offsets = [0, 128], sizes = [1, 32], strides = [1, 1]} : vector<1x256xf32> to vector<1x32xf32>
    %110 = vector.extract_strided_slice %95 {offsets = [0, 160], sizes = [1, 32], strides = [1, 1]} : vector<1x256xf32> to vector<1x32xf32>
    %111 = vector.extract_strided_slice %95 {offsets = [0, 192], sizes = [1, 32], strides = [1, 1]} : vector<1x256xf32> to vector<1x32xf32>
    %cst_43 = arith.constant 2.000000e+00 : f32
    %112 = vector.broadcast %cst_43 : f32 to vector<1x32xf32>
    %113 = arith.mulf %112, %111 : vector<1x32xf32>
    %cst_44 = arith.constant 1.000000e+00 : f32
    %114 = vector.broadcast %cst_44 : f32 to vector<1x32xf32>
    %115 = arith.subf %113, %114 : vector<1x32xf32>
    %116 = vector.extract_strided_slice %95 {offsets = [0, 224], sizes = [1, 32], strides = [1, 1]} : vector<1x256xf32> to vector<1x32xf32>
    %117 = arith.mulf %110, %77 : vector<1x32xf32>
    %118 = arith.mulf %109, %115 : vector<1x32xf32>
    %119 = arith.addf %117, %118 : vector<1x32xf32>
    %120 = math.tanh %119 : vector<1x32xf32>
    %121 = arith.mulf %116, %120 : vector<1x32xf32>
    %cst_45 = arith.constant dense<0.000000e+00> : vector<1x16xf32>
    %122 = tpu.matmul %121, %13, %cst_45 {dimension_numbers = #tpu.dot_dimension_numbers<[1], [0], [0], [1], [0, 0, 1, 1], [], []>} : vector<1x32xf32>, vector<32x16xf32>, vector<1x16xf32> -> vector<1x16xf32>
    %123 = arith.addf %122, %14 : vector<1x16xf32>
    %cst_46 = arith.constant dense<0.000000e+00> : vector<1x8xf32>
    %124 = tpu.matmul %123, %15, %cst_46 {dimension_numbers = #tpu.dot_dimension_numbers<[1], [0], [0], [1], [0, 0, 1, 1], [], []>} : vector<1x16xf32>, vector<16x8xf32>, vector<1x8xf32> -> vector<1x8xf32>
    %125 = arith.addf %124, %16 : vector<1x8xf32>
    %126 = tpu.concatenate %123, %125 in 1 : vector<1x16xf32>, vector<1x8xf32> -> vector<1x24xf32>
    %c1_47 = arith.constant 1 : index
    %c0_48 = arith.constant 0 : index
    %127 = vector.load %arg11[%c1_47, %c0_48] : memref<8x24xf32, #tpu.memory_space<vmem>>, vector<1x24xf32>
    tpu.vector_store %arg11[%c1_47, %c0_48], %126 {strides = array<i32>} : memref<8x24xf32, #tpu.memory_space<vmem>>, vector<1x24xf32>,
    %128 = tpu.concatenate %108, %121 in 1 : vector<1x32xf32>, vector<1x32xf32> -> vector<1x64xf32>
    %129 = arith.truncf %128 : vector<1x64xf32> to vector<1x64xbf16>
    %cst_49 = arith.constant dense<0.000000e+00> : vector<1x256xf32>
    %130 = tpu.matmul %129, %12, %cst_49 {dimension_numbers = #tpu.dot_dimension_numbers<[1], [0], [0], [1], [0, 0, 1, 1], [], []>} : vector<1x64xbf16>, vector<64x256xbf16>, vector<1x256xf32> -> vector<1x256xf32>
    %131 = vector.extract_strided_slice %11 {offsets = [3, 0], sizes = [1, 256], strides = [1, 1]} : vector<9x256xf32> to vector<1x256xf32>
    %132 = arith.addf %130, %131 : vector<1x256xf32>
    %133 = arith.negf %132 : vector<1x256xf32>
    %134 = math.exp %133 : vector<1x256xf32>
    %cst_50 = arith.constant 1.000000e+00 : f32
    %135 = vector.broadcast %cst_50 : f32 to vector<1x256xf32>
    %136 = arith.addf %135, %134 : vector<1x256xf32>
    %137 = arith.divf %135, %136 : vector<1x256xf32>
    %138 = vector.extract_strided_slice %137 {offsets = [0, 0], sizes = [1, 32], strides = [1, 1]} : vector<1x256xf32> to vector<1x32xf32>
    %139 = vector.extract_strided_slice %137 {offsets = [0, 32], sizes = [1, 32], strides = [1, 1]} : vector<1x256xf32> to vector<1x32xf32>
    %140 = vector.extract_strided_slice %137 {offsets = [0, 64], sizes = [1, 32], strides = [1, 1]} : vector<1x256xf32> to vector<1x32xf32>
    %cst_51 = arith.constant 2.000000e+00 : f32
    %141 = vector.broadcast %cst_51 : f32 to vector<1x32xf32>
    %142 = arith.mulf %141, %140 : vector<1x32xf32>
    %cst_52 = arith.constant 1.000000e+00 : f32
    %143 = vector.broadcast %cst_52 : f32 to vector<1x32xf32>
    %144 = arith.subf %142, %143 : vector<1x32xf32>
    %145 = vector.extract_strided_slice %137 {offsets = [0, 96], sizes = [1, 32], strides = [1, 1]} : vector<1x256xf32> to vector<1x32xf32>
    %146 = arith.mulf %139, %106 : vector<1x32xf32>
    %147 = arith.mulf %138, %144 : vector<1x32xf32>
    %148 = arith.addf %146, %147 : vector<1x32xf32>
    %149 = math.tanh %148 : vector<1x32xf32>
    %150 = arith.mulf %145, %149 : vector<1x32xf32>
    %151 = vector.extract_strided_slice %137 {offsets = [0, 128], sizes = [1, 32], strides = [1, 1]} : vector<1x256xf32> to vector<1x32xf32>
    %152 = vector.extract_strided_slice %137 {offsets = [0, 160], sizes = [1, 32], strides = [1, 1]} : vector<1x256xf32> to vector<1x32xf32>
    %153 = vector.extract_strided_slice %137 {offsets = [0, 192], sizes = [1, 32], strides = [1, 1]} : vector<1x256xf32> to vector<1x32xf32>
    %cst_53 = arith.constant 2.000000e+00 : f32
    %154 = vector.broadcast %cst_53 : f32 to vector<1x32xf32>
    %155 = arith.mulf %154, %153 : vector<1x32xf32>
    %cst_54 = arith.constant 1.000000e+00 : f32
    %156 = vector.broadcast %cst_54 : f32 to vector<1x32xf32>
    %157 = arith.subf %155, %156 : vector<1x32xf32>
    %158 = vector.extract_strided_slice %137 {offsets = [0, 224], sizes = [1, 32], strides = [1, 1]} : vector<1x256xf32> to vector<1x32xf32>
    %159 = arith.mulf %152, %119 : vector<1x32xf32>
    %160 = arith.mulf %151, %157 : vector<1x32xf32>
    %161 = arith.addf %159, %160 : vector<1x32xf32>
    %162 = math.tanh %161 : vector<1x32xf32>
    %163 = arith.mulf %158, %162 : vector<1x32xf32>
    %cst_55 = arith.constant dense<0.000000e+00> : vector<1x16xf32>
    %164 = tpu.matmul %163, %13, %cst_55 {dimension_numbers = #tpu.dot_dimension_numbers<[1], [0], [0], [1], [0, 0, 1, 1], [], []>} : vector<1x32xf32>, vector<32x16xf32>, vector<1x16xf32> -> vector<1x16xf32>
    %165 = arith.addf %164, %14 : vector<1x16xf32>
    %cst_56 = arith.constant dense<0.000000e+00> : vector<1x8xf32>
    %166 = tpu.matmul %165, %15, %cst_56 {dimension_numbers = #tpu.dot_dimension_numbers<[1], [0], [0], [1], [0, 0, 1, 1], [], []>} : vector<1x16xf32>, vector<16x8xf32>, vector<1x8xf32> -> vector<1x8xf32>
    %167 = arith.addf %166, %16 : vector<1x8xf32>
    %168 = tpu.concatenate %165, %167 in 1 : vector<1x16xf32>, vector<1x8xf32> -> vector<1x24xf32>
    %c2 = arith.constant 2 : index
    %c0_57 = arith.constant 0 : index
    %169 = vector.load %arg11[%c2, %c0_57] : memref<8x24xf32, #tpu.memory_space<vmem>>, vector<1x24xf32>
    tpu.vector_store %arg11[%c2, %c0_57], %168 {strides = array<i32>} : memref<8x24xf32, #tpu.memory_space<vmem>>, vector<1x24xf32>,
    %170 = tpu.concatenate %150, %163 in 1 : vector<1x32xf32>, vector<1x32xf32> -> vector<1x64xf32>
    %171 = arith.truncf %170 : vector<1x64xf32> to vector<1x64xbf16>
    %cst_58 = arith.constant dense<0.000000e+00> : vector<1x256xf32>
    %172 = tpu.matmul %171, %12, %cst_58 {dimension_numbers = #tpu.dot_dimension_numbers<[1], [0], [0], [1], [0, 0, 1, 1], [], []>} : vector<1x64xbf16>, vector<64x256xbf16>, vector<1x256xf32> -> vector<1x256xf32>
    %173 = vector.extract_strided_slice %11 {offsets = [4, 0], sizes = [1, 256], strides = [1, 1]} : vector<9x256xf32> to vector<1x256xf32>
    %174 = arith.addf %172, %173 : vector<1x256xf32>
    %175 = arith.negf %174 : vector<1x256xf32>
    %176 = math.exp %175 : vector<1x256xf32>
    %cst_59 = arith.constant 1.000000e+00 : f32
    %177 = vector.broadcast %cst_59 : f32 to vector<1x256xf32>
    %178 = arith.addf %177, %176 : vector<1x256xf32>
    %179 = arith.divf %177, %178 : vector<1x256xf32>
    %180 = vector.extract_strided_slice %179 {offsets = [0, 0], sizes = [1, 32], strides = [1, 1]} : vector<1x256xf32> to vector<1x32xf32>
    %181 = vector.extract_strided_slice %179 {offsets = [0, 32], sizes = [1, 32], strides = [1, 1]} : vector<1x256xf32> to vector<1x32xf32>
    %182 = vector.extract_strided_slice %179 {offsets = [0, 64], sizes = [1, 32], strides = [1, 1]} : vector<1x256xf32> to vector<1x32xf32>
    %cst_60 = arith.constant 2.000000e+00 : f32
    %183 = vector.broadcast %cst_60 : f32 to vector<1x32xf32>
    %184 = arith.mulf %183, %182 : vector<1x32xf32>
    %cst_61 = arith.constant 1.000000e+00 : f32
    %185 = vector.broadcast %cst_61 : f32 to vector<1x32xf32>
    %186 = arith.subf %184, %185 : vector<1x32xf32>
    %187 = vector.extract_strided_slice %179 {offsets = [0, 96], sizes = [1, 32], strides = [1, 1]} : vector<1x256xf32> to vector<1x32xf32>
    %188 = arith.mulf %181, %148 : vector<1x32xf32>
    %189 = arith.mulf %180, %186 : vector<1x32xf32>
    %190 = arith.addf %188, %189 : vector<1x32xf32>
    %191 = math.tanh %190 : vector<1x32xf32>
    %192 = arith.mulf %187, %191 : vector<1x32xf32>
    %193 = vector.extract_strided_slice %179 {offsets = [0, 128], sizes = [1, 32], strides = [1, 1]} : vector<1x256xf32> to vector<1x32xf32>
    %194 = vector.extract_strided_slice %179 {offsets = [0, 160], sizes = [1, 32], strides = [1, 1]} : vector<1x256xf32> to vector<1x32xf32>
    %195 = vector.extract_strided_slice %179 {offsets = [0, 192], sizes = [1, 32], strides = [1, 1]} : vector<1x256xf32> to vector<1x32xf32>
    %cst_62 = arith.constant 2.000000e+00 : f32
    %196 = vector.broadcast %cst_62 : f32 to vector<1x32xf32>
    %197 = arith.mulf %196, %195 : vector<1x32xf32>
    %cst_63 = arith.constant 1.000000e+00 : f32
    %198 = vector.broadcast %cst_63 : f32 to vector<1x32xf32>
    %199 = arith.subf %197, %198 : vector<1x32xf32>
    %200 = vector.extract_strided_slice %179 {offsets = [0, 224], sizes = [1, 32], strides = [1, 1]} : vector<1x256xf32> to vector<1x32xf32>
    %201 = arith.mulf %194, %161 : vector<1x32xf32>
    %202 = arith.mulf %193, %199 : vector<1x32xf32>
    %203 = arith.addf %201, %202 : vector<1x32xf32>
    %204 = math.tanh %203 : vector<1x32xf32>
    %205 = arith.mulf %200, %204 : vector<1x32xf32>
    %cst_64 = arith.constant dense<0.000000e+00> : vector<1x16xf32>
    %206 = tpu.matmul %205, %13, %cst_64 {dimension_numbers = #tpu.dot_dimension_numbers<[1], [0], [0], [1], [0, 0, 1, 1], [], []>} : vector<1x32xf32>, vector<32x16xf32>, vector<1x16xf32> -> vector<1x16xf32>
    %207 = arith.addf %206, %14 : vector<1x16xf32>
    %cst_65 = arith.constant dense<0.000000e+00> : vector<1x8xf32>
    %208 = tpu.matmul %207, %15, %cst_65 {dimension_numbers = #tpu.dot_dimension_numbers<[1], [0], [0], [1], [0, 0, 1, 1], [], []>} : vector<1x16xf32>, vector<16x8xf32>, vector<1x8xf32> -> vector<1x8xf32>
    %209 = arith.addf %208, %16 : vector<1x8xf32>
    %210 = tpu.concatenate %207, %209 in 1 : vector<1x16xf32>, vector<1x8xf32> -> vector<1x24xf32>
    %c3 = arith.constant 3 : index
    %c0_66 = arith.constant 0 : index
    %211 = vector.load %arg11[%c3, %c0_66] : memref<8x24xf32, #tpu.memory_space<vmem>>, vector<1x24xf32>
    tpu.vector_store %arg11[%c3, %c0_66], %210 {strides = array<i32>} : memref<8x24xf32, #tpu.memory_space<vmem>>, vector<1x24xf32>,
    %212 = tpu.concatenate %192, %205 in 1 : vector<1x32xf32>, vector<1x32xf32> -> vector<1x64xf32>
    %213 = arith.truncf %212 : vector<1x64xf32> to vector<1x64xbf16>
    %cst_67 = arith.constant dense<0.000000e+00> : vector<1x256xf32>
    %214 = tpu.matmul %213, %12, %cst_67 {dimension_numbers = #tpu.dot_dimension_numbers<[1], [0], [0], [1], [0, 0, 1, 1], [], []>} : vector<1x64xbf16>, vector<64x256xbf16>, vector<1x256xf32> -> vector<1x256xf32>
    %215 = vector.extract_strided_slice %11 {offsets = [5, 0], sizes = [1, 256], strides = [1, 1]} : vector<9x256xf32> to vector<1x256xf32>
    %216 = arith.addf %214, %215 : vector<1x256xf32>
    %217 = arith.negf %216 : vector<1x256xf32>
    %218 = math.exp %217 : vector<1x256xf32>
    %cst_68 = arith.constant 1.000000e+00 : f32
    %219 = vector.broadcast %cst_68 : f32 to vector<1x256xf32>
    %220 = arith.addf %219, %218 : vector<1x256xf32>
    %221 = arith.divf %219, %220 : vector<1x256xf32>
    %222 = vector.extract_strided_slice %221 {offsets = [0, 0], sizes = [1, 32], strides = [1, 1]} : vector<1x256xf32> to vector<1x32xf32>
    %223 = vector.extract_strided_slice %221 {offsets = [0, 32], sizes = [1, 32], strides = [1, 1]} : vector<1x256xf32> to vector<1x32xf32>
    %224 = vector.extract_strided_slice %221 {offsets = [0, 64], sizes = [1, 32], strides = [1, 1]} : vector<1x256xf32> to vector<1x32xf32>
    %cst_69 = arith.constant 2.000000e+00 : f32
    %225 = vector.broadcast %cst_69 : f32 to vector<1x32xf32>
    %226 = arith.mulf %225, %224 : vector<1x32xf32>
    %cst_70 = arith.constant 1.000000e+00 : f32
    %227 = vector.broadcast %cst_70 : f32 to vector<1x32xf32>
    %228 = arith.subf %226, %227 : vector<1x32xf32>
    %229 = vector.extract_strided_slice %221 {offsets = [0, 96], sizes = [1, 32], strides = [1, 1]} : vector<1x256xf32> to vector<1x32xf32>
    %230 = arith.mulf %223, %190 : vector<1x32xf32>
    %231 = arith.mulf %222, %228 : vector<1x32xf32>
    %232 = arith.addf %230, %231 : vector<1x32xf32>
    %233 = math.tanh %232 : vector<1x32xf32>
    %234 = arith.mulf %229, %233 : vector<1x32xf32>
    %235 = vector.extract_strided_slice %221 {offsets = [0, 128], sizes = [1, 32], strides = [1, 1]} : vector<1x256xf32> to vector<1x32xf32>
    %236 = vector.extract_strided_slice %221 {offsets = [0, 160], sizes = [1, 32], strides = [1, 1]} : vector<1x256xf32> to vector<1x32xf32>
    %237 = vector.extract_strided_slice %221 {offsets = [0, 192], sizes = [1, 32], strides = [1, 1]} : vector<1x256xf32> to vector<1x32xf32>
    %cst_71 = arith.constant 2.000000e+00 : f32
    %238 = vector.broadcast %cst_71 : f32 to vector<1x32xf32>
    %239 = arith.mulf %238, %237 : vector<1x32xf32>
    %cst_72 = arith.constant 1.000000e+00 : f32
    %240 = vector.broadcast %cst_72 : f32 to vector<1x32xf32>
    %241 = arith.subf %239, %240 : vector<1x32xf32>
    %242 = vector.extract_strided_slice %221 {offsets = [0, 224], sizes = [1, 32], strides = [1, 1]} : vector<1x256xf32> to vector<1x32xf32>
    %243 = arith.mulf %236, %203 : vector<1x32xf32>
    %244 = arith.mulf %235, %241 : vector<1x32xf32>
    %245 = arith.addf %243, %244 : vector<1x32xf32>
    %246 = math.tanh %245 : vector<1x32xf32>
    %247 = arith.mulf %242, %246 : vector<1x32xf32>
    %cst_73 = arith.constant dense<0.000000e+00> : vector<1x16xf32>
    %248 = tpu.matmul %247, %13, %cst_73 {dimension_numbers = #tpu.dot_dimension_numbers<[1], [0], [0], [1], [0, 0, 1, 1], [], []>} : vector<1x32xf32>, vector<32x16xf32>, vector<1x16xf32> -> vector<1x16xf32>
    %249 = arith.addf %248, %14 : vector<1x16xf32>
    %cst_74 = arith.constant dense<0.000000e+00> : vector<1x8xf32>
    %250 = tpu.matmul %249, %15, %cst_74 {dimension_numbers = #tpu.dot_dimension_numbers<[1], [0], [0], [1], [0, 0, 1, 1], [], []>} : vector<1x16xf32>, vector<16x8xf32>, vector<1x8xf32> -> vector<1x8xf32>
    %251 = arith.addf %250, %16 : vector<1x8xf32>
    %252 = tpu.concatenate %249, %251 in 1 : vector<1x16xf32>, vector<1x8xf32> -> vector<1x24xf32>
    %c4 = arith.constant 4 : index
    %c0_75 = arith.constant 0 : index
    %253 = vector.load %arg11[%c4, %c0_75] : memref<8x24xf32, #tpu.memory_space<vmem>>, vector<1x24xf32>
    tpu.vector_store %arg11[%c4, %c0_75], %252 {strides = array<i32>} : memref<8x24xf32, #tpu.memory_space<vmem>>, vector<1x24xf32>,
    %254 = tpu.concatenate %234, %247 in 1 : vector<1x32xf32>, vector<1x32xf32> -> vector<1x64xf32>
    %255 = arith.truncf %254 : vector<1x64xf32> to vector<1x64xbf16>
    %cst_76 = arith.constant dense<0.000000e+00> : vector<1x256xf32>
    %256 = tpu.matmul %255, %12, %cst_76 {dimension_numbers = #tpu.dot_dimension_numbers<[1], [0], [0], [1], [0, 0, 1, 1], [], []>} : vector<1x64xbf16>, vector<64x256xbf16>, vector<1x256xf32> -> vector<1x256xf32>
    %257 = vector.extract_strided_slice %11 {offsets = [6, 0], sizes = [1, 256], strides = [1, 1]} : vector<9x256xf32> to vector<1x256xf32>
    %258 = arith.addf %256, %257 : vector<1x256xf32>
    %259 = arith.negf %258 : vector<1x256xf32>
    %260 = math.exp %259 : vector<1x256xf32>
    %cst_77 = arith.constant 1.000000e+00 : f32
    %261 = vector.broadcast %cst_77 : f32 to vector<1x256xf32>
    %262 = arith.addf %261, %260 : vector<1x256xf32>
    %263 = arith.divf %261, %262 : vector<1x256xf32>
    %264 = vector.extract_strided_slice %263 {offsets = [0, 0], sizes = [1, 32], strides = [1, 1]} : vector<1x256xf32> to vector<1x32xf32>
    %265 = vector.extract_strided_slice %263 {offsets = [0, 32], sizes = [1, 32], strides = [1, 1]} : vector<1x256xf32> to vector<1x32xf32>
    %266 = vector.extract_strided_slice %263 {offsets = [0, 64], sizes = [1, 32], strides = [1, 1]} : vector<1x256xf32> to vector<1x32xf32>
    %cst_78 = arith.constant 2.000000e+00 : f32
    %267 = vector.broadcast %cst_78 : f32 to vector<1x32xf32>
    %268 = arith.mulf %267, %266 : vector<1x32xf32>
    %cst_79 = arith.constant 1.000000e+00 : f32
    %269 = vector.broadcast %cst_79 : f32 to vector<1x32xf32>
    %270 = arith.subf %268, %269 : vector<1x32xf32>
    %271 = vector.extract_strided_slice %263 {offsets = [0, 96], sizes = [1, 32], strides = [1, 1]} : vector<1x256xf32> to vector<1x32xf32>
    %272 = arith.mulf %265, %232 : vector<1x32xf32>
    %273 = arith.mulf %264, %270 : vector<1x32xf32>
    %274 = arith.addf %272, %273 : vector<1x32xf32>
    %275 = math.tanh %274 : vector<1x32xf32>
    %276 = arith.mulf %271, %275 : vector<1x32xf32>
    %277 = vector.extract_strided_slice %263 {offsets = [0, 128], sizes = [1, 32], strides = [1, 1]} : vector<1x256xf32> to vector<1x32xf32>
    %278 = vector.extract_strided_slice %263 {offsets = [0, 160], sizes = [1, 32], strides = [1, 1]} : vector<1x256xf32> to vector<1x32xf32>
    %279 = vector.extract_strided_slice %263 {offsets = [0, 192], sizes = [1, 32], strides = [1, 1]} : vector<1x256xf32> to vector<1x32xf32>
    %cst_80 = arith.constant 2.000000e+00 : f32
    %280 = vector.broadcast %cst_80 : f32 to vector<1x32xf32>
    %281 = arith.mulf %280, %279 : vector<1x32xf32>
    %cst_81 = arith.constant 1.000000e+00 : f32
    %282 = vector.broadcast %cst_81 : f32 to vector<1x32xf32>
    %283 = arith.subf %281, %282 : vector<1x32xf32>
    %284 = vector.extract_strided_slice %263 {offsets = [0, 224], sizes = [1, 32], strides = [1, 1]} : vector<1x256xf32> to vector<1x32xf32>
    %285 = arith.mulf %278, %245 : vector<1x32xf32>
    %286 = arith.mulf %277, %283 : vector<1x32xf32>
    %287 = arith.addf %285, %286 : vector<1x32xf32>
    %288 = math.tanh %287 : vector<1x32xf32>
    %289 = arith.mulf %284, %288 : vector<1x32xf32>
    %cst_82 = arith.constant dense<0.000000e+00> : vector<1x16xf32>
    %290 = tpu.matmul %289, %13, %cst_82 {dimension_numbers = #tpu.dot_dimension_numbers<[1], [0], [0], [1], [0, 0, 1, 1], [], []>} : vector<1x32xf32>, vector<32x16xf32>, vector<1x16xf32> -> vector<1x16xf32>
    %291 = arith.addf %290, %14 : vector<1x16xf32>
    %cst_83 = arith.constant dense<0.000000e+00> : vector<1x8xf32>
    %292 = tpu.matmul %291, %15, %cst_83 {dimension_numbers = #tpu.dot_dimension_numbers<[1], [0], [0], [1], [0, 0, 1, 1], [], []>} : vector<1x16xf32>, vector<16x8xf32>, vector<1x8xf32> -> vector<1x8xf32>
    %293 = arith.addf %292, %16 : vector<1x8xf32>
    %294 = tpu.concatenate %291, %293 in 1 : vector<1x16xf32>, vector<1x8xf32> -> vector<1x24xf32>
    %c5 = arith.constant 5 : index
    %c0_84 = arith.constant 0 : index
    %295 = vector.load %arg11[%c5, %c0_84] : memref<8x24xf32, #tpu.memory_space<vmem>>, vector<1x24xf32>
    tpu.vector_store %arg11[%c5, %c0_84], %294 {strides = array<i32>} : memref<8x24xf32, #tpu.memory_space<vmem>>, vector<1x24xf32>,
    %296 = tpu.concatenate %276, %289 in 1 : vector<1x32xf32>, vector<1x32xf32> -> vector<1x64xf32>
    %297 = arith.truncf %296 : vector<1x64xf32> to vector<1x64xbf16>
    %cst_85 = arith.constant dense<0.000000e+00> : vector<1x256xf32>
    %298 = tpu.matmul %297, %12, %cst_85 {dimension_numbers = #tpu.dot_dimension_numbers<[1], [0], [0], [1], [0, 0, 1, 1], [], []>} : vector<1x64xbf16>, vector<64x256xbf16>, vector<1x256xf32> -> vector<1x256xf32>
    %299 = vector.extract_strided_slice %11 {offsets = [7, 0], sizes = [1, 256], strides = [1, 1]} : vector<9x256xf32> to vector<1x256xf32>
    %300 = arith.addf %298, %299 : vector<1x256xf32>
    %301 = arith.negf %300 : vector<1x256xf32>
    %302 = math.exp %301 : vector<1x256xf32>
    %cst_86 = arith.constant 1.000000e+00 : f32
    %303 = vector.broadcast %cst_86 : f32 to vector<1x256xf32>
    %304 = arith.addf %303, %302 : vector<1x256xf32>
    %305 = arith.divf %303, %304 : vector<1x256xf32>
    %306 = vector.extract_strided_slice %305 {offsets = [0, 0], sizes = [1, 32], strides = [1, 1]} : vector<1x256xf32> to vector<1x32xf32>
    %307 = vector.extract_strided_slice %305 {offsets = [0, 32], sizes = [1, 32], strides = [1, 1]} : vector<1x256xf32> to vector<1x32xf32>
    %308 = vector.extract_strided_slice %305 {offsets = [0, 64], sizes = [1, 32], strides = [1, 1]} : vector<1x256xf32> to vector<1x32xf32>
    %cst_87 = arith.constant 2.000000e+00 : f32
    %309 = vector.broadcast %cst_87 : f32 to vector<1x32xf32>
    %310 = arith.mulf %309, %308 : vector<1x32xf32>
    %cst_88 = arith.constant 1.000000e+00 : f32
    %311 = vector.broadcast %cst_88 : f32 to vector<1x32xf32>
    %312 = arith.subf %310, %311 : vector<1x32xf32>
    %313 = vector.extract_strided_slice %305 {offsets = [0, 96], sizes = [1, 32], strides = [1, 1]} : vector<1x256xf32> to vector<1x32xf32>
    %314 = arith.mulf %307, %274 : vector<1x32xf32>
    %315 = arith.mulf %306, %312 : vector<1x32xf32>
    %316 = arith.addf %314, %315 : vector<1x32xf32>
    %317 = math.tanh %316 : vector<1x32xf32>
    %318 = arith.mulf %313, %317 : vector<1x32xf32>
    %319 = vector.extract_strided_slice %305 {offsets = [0, 128], sizes = [1, 32], strides = [1, 1]} : vector<1x256xf32> to vector<1x32xf32>
    %320 = vector.extract_strided_slice %305 {offsets = [0, 160], sizes = [1, 32], strides = [1, 1]} : vector<1x256xf32> to vector<1x32xf32>
    %321 = vector.extract_strided_slice %305 {offsets = [0, 192], sizes = [1, 32], strides = [1, 1]} : vector<1x256xf32> to vector<1x32xf32>
    %cst_89 = arith.constant 2.000000e+00 : f32
    %322 = vector.broadcast %cst_89 : f32 to vector<1x32xf32>
    %323 = arith.mulf %322, %321 : vector<1x32xf32>
    %cst_90 = arith.constant 1.000000e+00 : f32
    %324 = vector.broadcast %cst_90 : f32 to vector<1x32xf32>
    %325 = arith.subf %323, %324 : vector<1x32xf32>
    %326 = vector.extract_strided_slice %305 {offsets = [0, 224], sizes = [1, 32], strides = [1, 1]} : vector<1x256xf32> to vector<1x32xf32>
    %327 = arith.mulf %320, %287 : vector<1x32xf32>
    %328 = arith.mulf %319, %325 : vector<1x32xf32>
    %329 = arith.addf %327, %328 : vector<1x32xf32>
    %330 = math.tanh %329 : vector<1x32xf32>
    %331 = arith.mulf %326, %330 : vector<1x32xf32>
    %cst_91 = arith.constant dense<0.000000e+00> : vector<1x16xf32>
    %332 = tpu.matmul %331, %13, %cst_91 {dimension_numbers = #tpu.dot_dimension_numbers<[1], [0], [0], [1], [0, 0, 1, 1], [], []>} : vector<1x32xf32>, vector<32x16xf32>, vector<1x16xf32> -> vector<1x16xf32>
    %333 = arith.addf %332, %14 : vector<1x16xf32>
    %cst_92 = arith.constant dense<0.000000e+00> : vector<1x8xf32>
    %334 = tpu.matmul %333, %15, %cst_92 {dimension_numbers = #tpu.dot_dimension_numbers<[1], [0], [0], [1], [0, 0, 1, 1], [], []>} : vector<1x16xf32>, vector<16x8xf32>, vector<1x8xf32> -> vector<1x8xf32>
    %335 = arith.addf %334, %16 : vector<1x8xf32>
    %336 = tpu.concatenate %333, %335 in 1 : vector<1x16xf32>, vector<1x8xf32> -> vector<1x24xf32>
    %c6 = arith.constant 6 : index
    %c0_93 = arith.constant 0 : index
    %337 = vector.load %arg11[%c6, %c0_93] : memref<8x24xf32, #tpu.memory_space<vmem>>, vector<1x24xf32>
    tpu.vector_store %arg11[%c6, %c0_93], %336 {strides = array<i32>} : memref<8x24xf32, #tpu.memory_space<vmem>>, vector<1x24xf32>,
    %338 = tpu.concatenate %318, %331 in 1 : vector<1x32xf32>, vector<1x32xf32> -> vector<1x64xf32>
    %339 = arith.truncf %338 : vector<1x64xf32> to vector<1x64xbf16>
    %cst_94 = arith.constant dense<0.000000e+00> : vector<1x256xf32>
    %340 = tpu.matmul %339, %12, %cst_94 {dimension_numbers = #tpu.dot_dimension_numbers<[1], [0], [0], [1], [0, 0, 1, 1], [], []>} : vector<1x64xbf16>, vector<64x256xbf16>, vector<1x256xf32> -> vector<1x256xf32>
    %341 = vector.extract_strided_slice %11 {offsets = [8, 0], sizes = [1, 256], strides = [1, 1]} : vector<9x256xf32> to vector<1x256xf32>
    %342 = arith.addf %340, %341 : vector<1x256xf32>
    %343 = arith.negf %342 : vector<1x256xf32>
    %344 = math.exp %343 : vector<1x256xf32>
    %cst_95 = arith.constant 1.000000e+00 : f32
    %345 = vector.broadcast %cst_95 : f32 to vector<1x256xf32>
    %346 = arith.addf %345, %344 : vector<1x256xf32>
    %347 = arith.divf %345, %346 : vector<1x256xf32>
    %348 = vector.extract_strided_slice %347 {offsets = [0, 128], sizes = [1, 32], strides = [1, 1]} : vector<1x256xf32> to vector<1x32xf32>
    %349 = vector.extract_strided_slice %347 {offsets = [0, 160], sizes = [1, 32], strides = [1, 1]} : vector<1x256xf32> to vector<1x32xf32>
    %350 = vector.extract_strided_slice %347 {offsets = [0, 192], sizes = [1, 32], strides = [1, 1]} : vector<1x256xf32> to vector<1x32xf32>
    %cst_96 = arith.constant 2.000000e+00 : f32
    %351 = vector.broadcast %cst_96 : f32 to vector<1x32xf32>
    %352 = arith.mulf %351, %350 : vector<1x32xf32>
    %cst_97 = arith.constant 1.000000e+00 : f32
    %353 = vector.broadcast %cst_97 : f32 to vector<1x32xf32>
    %354 = arith.subf %352, %353 : vector<1x32xf32>
    %355 = vector.extract_strided_slice %347 {offsets = [0, 224], sizes = [1, 32], strides = [1, 1]} : vector<1x256xf32> to vector<1x32xf32>
    %356 = arith.mulf %349, %329 : vector<1x32xf32>
    %357 = arith.mulf %348, %354 : vector<1x32xf32>
    %358 = arith.addf %356, %357 : vector<1x32xf32>
    %359 = math.tanh %358 : vector<1x32xf32>
    %360 = arith.mulf %355, %359 : vector<1x32xf32>
    %cst_98 = arith.constant dense<0.000000e+00> : vector<1x16xf32>
    %361 = tpu.matmul %360, %13, %cst_98 {dimension_numbers = #tpu.dot_dimension_numbers<[1], [0], [0], [1], [0, 0, 1, 1], [], []>} : vector<1x32xf32>, vector<32x16xf32>, vector<1x16xf32> -> vector<1x16xf32>
    %362 = arith.addf %361, %14 : vector<1x16xf32>
    %cst_99 = arith.constant dense<0.000000e+00> : vector<1x8xf32>
    %363 = tpu.matmul %362, %15, %cst_99 {dimension_numbers = #tpu.dot_dimension_numbers<[1], [0], [0], [1], [0, 0, 1, 1], [], []>} : vector<1x16xf32>, vector<16x8xf32>, vector<1x8xf32> -> vector<1x8xf32>
    %364 = arith.addf %363, %16 : vector<1x8xf32>
    %365 = tpu.concatenate %362, %364 in 1 : vector<1x16xf32>, vector<1x8xf32> -> vector<1x24xf32>
    %c7 = arith.constant 7 : index
    %c0_100 = arith.constant 0 : index
    %366 = vector.load %arg11[%c7, %c0_100] : memref<8x24xf32, #tpu.memory_space<vmem>>, vector<1x24xf32>
    tpu.vector_store %arg11[%c7, %c0_100], %365 {strides = array<i32>} : memref<8x24xf32, #tpu.memory_space<vmem>>, vector<1x24xf32>,
    %c0_101 = arith.constant 0 : index
    %c0_102 = arith.constant 0 : index
    %367 = vector.load %arg12[%c0_101, %c0_102] : memref<4x32xf32, #tpu.memory_space<vmem>>, vector<1x32xf32>
    tpu.vector_store %arg12[%c0_101, %c0_102], %318 {strides = array<i32>} : memref<4x32xf32, #tpu.memory_space<vmem>>, vector<1x32xf32>,
    %c2_103 = arith.constant 2 : index
    %c0_104 = arith.constant 0 : index
    %368 = vector.load %arg12[%c2_103, %c0_104] : memref<4x32xf32, #tpu.memory_space<vmem>>, vector<1x32xf32>
    tpu.vector_store %arg12[%c2_103, %c0_104], %316 {strides = array<i32>} : memref<4x32xf32, #tpu.memory_space<vmem>>, vector<1x32xf32>,
    %c1_105 = arith.constant 1 : index
    %c0_106 = arith.constant 0 : index
    %369 = vector.load %arg12[%c1_105, %c0_106] : memref<4x32xf32, #tpu.memory_space<vmem>>, vector<1x32xf32>
    tpu.vector_store %arg12[%c1_105, %c0_106], %360 {strides = array<i32>} : memref<4x32xf32, #tpu.memory_space<vmem>>, vector<1x32xf32>,
    %c3_107 = arith.constant 3 : index
    %c0_108 = arith.constant 0 : index
    %370 = vector.load %arg12[%c3_107, %c0_108] : memref<4x32xf32, #tpu.memory_space<vmem>>, vector<1x32xf32>
    tpu.vector_store %arg12[%c3_107, %c0_108], %358 {strides = array<i32>} : memref<4x32xf32, #tpu.memory_space<vmem>>, vector<1x32xf32>,
    return
  }
}

</mosaic_0001>

<bundles_post_ra>
// kernel: tpu_custom_call.1
= control target key start
LH: loop header
LB: loop body
LE: loop exit
PB: predicated region body
PF: predicated region fallthrough
CT: control target
= control target key end

     0   :  { %18 = vsyncpa [#allocation3], 0  ;;  %s3796_s0 = inlined_call_operand.hbm [shape: f32[8,16], index: 0, kind: input, shape index: {}]   ;;  %s3797_s1 = inlined_call_operand.hbm [shape: f32[2,32], index: 1, kind: input, shape index: {}]   ;;  %s3798_s2 = inlined_call_operand.hbm [shape: f32[2,32], index: 2, kind: input, shape index: {}]   ;;  %s3799_s3 = inlined_call_operand.hbm [shape: f32[16,128], index: 3, kind: input, shape index: {}]   ;;  %s3800_s4 = inlined_call_operand.hbm [shape: f32[1,128], index: 4, kind: input, shape index: {}]   ;;  %s3801_s5 = inlined_call_operand.hbm [shape: f32[1,128], index: 5, kind: input, shape index: {}]   ;;  %s3802_s6 = inlined_call_operand.vmem [shape: bf16[64,256], index: 6, kind: input, shape index: {}]   ;;  %s3803_s7 = inlined_call_operand.vmem [shape: f32[32,16], index: 7, kind: input, shape index: {}]   ;;  %s3804_s8 = inlined_call_operand.hbm [shape: f32[1,16], index: 8, kind: input, shape index: {}]   ;;  %s3805_s9 = inlined_call_operand.vmem [shape: f32[16,8], index: 9, kind: input, shape index: {}]   ;;  %s3806_s10 = inlined_call_operand.vmem [shape: f32[1,8], index: 10, kind: input, shape index: {}]   ;;  %s3807_s11 = inlined_call_operand.hbm [shape: f32[8,24], index: 11, kind: output, shape index: {0}]   ;;  %s3808_s12 = inlined_call_operand.hbm [shape: f32[4,32], index: 12, kind: output, shape index: {1}]  }
   0x1   :  { %19 = vsyncpa [#allocation6], 0 }
   0x2   :  { %20 = vsyncpa [#allocation9], 0 }
   0x3   :  { %21 = vsyncpa [#allocation12], 0 }
   0x4   :  { %22 = vsyncpa [#allocation4], 0 }
   0x5   :  { %23 = vsyncpa [#allocation16], 0  ;;  %s3080_s21 = smov [#allocation5]   ;;  %s3081_s23 = smov [#allocation8]  }
   0x6   :  { %s40_s22 = sshll.u32 %s3080_s21, 4  ;;  %s59_s24 = sshll.u32 %s3081_s23, 4  ;;  %s41_s22 = int_to_ptr.vmem [resolvable:$true] %s40_s22  ;;  %s60_s24 = int_to_ptr.vmem [resolvable:$true] %s59_s24 }
   0x7   :  { %s2896_s25 = scalar_lea.vmem %s41_s22, 32  ;;  %p2901_p1 = scmp.lt.s32.totalorder %s41_s22, %s41_s22 }
   0x8   :  { %p2897_p0 = scmp.ne.s32.totalorder %s41_s22, %s2896_s25  ;;  %p2902_p2 = scmp.lt.s32.totalorder %s2896_s25, %s2896_s25 }
   0xa   :  { %p2903_p3 = por %p2902_p2, %p2901_p1 }
   0xc   :  { %p2904_p4 = pnand %p2903_p3, %p2897_p0 }
   0xe   :  { %2907 = shalt.err (!%p2904_p4)
}
   0xf   :  { %43 = dma.hbm_to_vmem [thread:$0]  %s3797_s1, 32, %s41_s22, [#allocation6]  }
  0x10   :  { %s2916_s28 = scalar_lea.vmem %s60_s24, 256  ;;  %p2921_p6 = scmp.lt.s32.totalorder %s60_s24, %s60_s24 }
  0x11   :  { %p2917_p5 = scmp.ne.s32.totalorder %s60_s24, %s2916_s28  ;;  %p2922_p7 = scmp.lt.s32.totalorder %s2916_s28, %s2916_s28 }
  0x13   :  { %p2923_p8 = por %p2922_p7, %p2921_p6 }
  0x15   :  { %p2924_p9 = pnand %p2923_p8, %p2917_p5 }
  0x17   :  { %2927 = shalt.err (!%p2924_p9)
}
  0x18   :  { %s3082_s29 = smov 128   ;;  %s3083_s30 = smov 8  }
  0x19   :  { %65 = dma.hbm_to_vmem [thread:$0]  %s3799_s3, 256, %s60_s24, [#allocation9], %s3082_s29, %s3082_s29, %s3083_s30  }
  0x1a   :  { %s3084_s15 = smov [#allocation11]   ;;  %s3085_s17 = smov [#allocation2]  }
  0x1b   :  { %s82_s16 = sshll.u32 %s3084_s15, 4  ;;  %s30_s18 = sshll.u32 %s3085_s17, 4  ;;  %s83_s16 = int_to_ptr.vmem [resolvable:$true] %s82_s16  ;;  %s31_s18 = int_to_ptr.vmem [resolvable:$true] %s30_s18 }
  0x1c   :  { %s2936_s1 = scalar_lea.vmem %s83_s16, 16  ;;  %s2940_s19 = scalar_lea.vmem %s83_s16, 32 }
  0x1d   :  { %p2937_p10 = scmp.ne.s32.totalorder %s83_s16, %s2936_s1  ;;  %p2941_p11 = scmp.lt.s32.totalorder %s83_s16, %s83_s16 }
  0x1e   :  { %p2942_p12 = scmp.lt.s32.totalorder %s2940_s19, %s2936_s1 }
  0x20   :  { %p2943_p13 = por %p2942_p12, %p2941_p11 }
  0x22   :  { %p2944_p0 = pnand %p2943_p13, %p2937_p10 }
  0x24   :  { %2947 = shalt.err (!%p2944_p0)
}
  0x25   :  { %85 = dma.hbm_to_vmem [thread:$0]  %s3801_s5, 16, %s83_s16, [#allocation12]  }
  0x26   :  { %s2956_s22 = scalar_lea.vmem %s31_s18, 128  ;;  %p2961_p2 = scmp.lt.s32.totalorder %s31_s18, %s31_s18 }
  0x27   :  { %p2957_p1 = scmp.ne.s32.totalorder %s31_s18, %s2956_s22  ;;  %p2962_p3 = scmp.lt.s32.totalorder %s2956_s22, %s2956_s22 }
  0x29   :  { %p2963_p4 = por %p2962_p3, %p2961_p2 }
  0x2b   :  { %p2964_p5 = pnand %p2963_p4, %p2957_p1 }
  0x2d   :  { %2967 = shalt.err (!%p2964_p5)
}
  0x2e   :  { %33 = dma.hbm_to_vmem [thread:$0]  %s3796_s0, 128, %s31_s18, [#allocation3]  }
  0x2f   :  { %s3086_s24 = smov [#allocation7]   ;;  %s3087_s26 = smov [#allocation10]  }
  0x30   :  { %s50_s25 = sshll.u32 %s3086_s24, 4  ;;  %s72_s27 = sshll.u32 %s3087_s26, 4  ;;  %s51_s25 = int_to_ptr.vmem [resolvable:$true] %s50_s25  ;;  %s73_s27 = int_to_ptr.vmem [resolvable:$true] %s72_s27 }
  0x31   :  { %s2976_s28 = scalar_lea.vmem %s51_s25, 32  ;;  %p2981_p7 = scmp.lt.s32.totalorder %s51_s25, %s51_s25 }
  0x32   :  { %p2977_p6 = scmp.ne.s32.totalorder %s51_s25, %s2976_s28  ;;  %p2982_p8 = scmp.lt.s32.totalorder %s2976_s28, %s2976_s28 }
  0x34   :  { %p2983_p9 = por %p2982_p8, %p2981_p7 }
  0x36   :  { %p2984_p10 = pnand %p2983_p9, %p2977_p6 }
  0x38   :  { %2987 = shalt.err (!%p2984_p10)
}
  0x39   :  { %53 = dma.hbm_to_vmem [thread:$0]  %s3798_s2, 32, %s51_s25, [#allocation6]  }
  0x3a   :  { %s2996_s30 = scalar_lea.vmem %s73_s27, 16  ;;  %s3000_s0 = scalar_lea.vmem %s73_s27, 32 }
  0x3b   :  { %p2997_p11 = scmp.ne.s32.totalorder %s73_s27, %s2996_s30  ;;  %p3001_p12 = scmp.lt.s32.totalorder %s73_s27, %s73_s27 }
  0x3c   :  { %p3002_p13 = scmp.lt.s32.totalorder %s3000_s0, %s2996_s30 }
  0x3e   :  { %p3003_p0 = por %p3002_p13, %p3001_p12 }
  0x40   :  { %p3004_p1 = pnand %p3003_p0, %p2997_p11 }
  0x42   :  { %3007 = shalt.err (!%p3004_p1)
}
  0x43   :  { %75 = dma.hbm_to_vmem [thread:$0]  %s3800_s4, 16, %s73_s27, [#allocation9]  }
  0x44   :  { %s3088_s15 = smov [#allocation13]  }
  0x45   :  { %s96_s16 = sshll.u32 %s3088_s15, 4  ;;  %s97_s16 = int_to_ptr.vmem [resolvable:$true] %s96_s16 }
  0x46   :  { %s3016_s17 = scalar_lea.vmem %s97_s16, 16  ;;  %s3020_s18 = scalar_lea.vmem %s97_s16, 32 }
  0x47   :  { %p3017_p2 = scmp.ne.s32.totalorder %s97_s16, %s3016_s17  ;;  %p3021_p3 = scmp.lt.s32.totalorder %s97_s16, %s97_s16 }
  0x48   :  { %p3022_p4 = scmp.lt.s32.totalorder %s3020_s18, %s3016_s17 }
  0x4a   :  { %p3023_p5 = por %p3022_p4, %p3021_p3 }
  0x4c   :  { %p3024_p6 = pnand %p3023_p5, %p3017_p2 }
  0x4e   :  { %3027 = shalt.err (!%p3024_p6)
}
  0x4f   :  { %99 = dma.hbm_to_vmem [thread:$0]  %s3804_s8, 16, %s97_s16, [#allocation12]  }
  0x50   :  { %3068 = dma.done.wait [#allocation3], 128  }
  0x51   :  { %3069 = vsyncadd [#allocation3], 4294967168 }
  0x52   :  { %3070 = dma.done.wait [#allocation6], 64  }
  0x53   :  { %3071 = vsyncadd [#allocation6], 4294967232 }
  0x54   :  { %3072 = dma.done.wait [#allocation9], 272  }
  0x55   :  { %3073 = vsyncadd [#allocation9], 4294967024 }
  0x56   :  { %3074 = dma.done.wait [#allocation12], 32  }
  0x57   :  { %3075 = vsyncadd [#allocation12], 4294967264  ;;  %v3089_v0 = vmov 0.0   ;;  %vm3090_vm0 = vmmov 0   ;;  %v3091_v1 = vmov 0   ;;  %s3092_s4 = smov 32  }
  0x58   :  { %2599 = vmatprep.subr.mxu0 %v3089_v0  ;;  %2603 = vmatprep.mubr.msk.f32.mxu0 %vm3090_vm0, %v3089_v0  ;;  %v234_v2 = vld [vmem:[#allocation5 + $0x1] sm:$0x1]  ;;  %v3192_v3 = vld [vmem:[%s3802_s6 + $0x34] ss:$8 sps:$4 sm:$0xff]   ;;  %v3197_v4 = vld [vmem:[%s3802_s6 + $0x30] ss:$8 sps:$4 sm:$0xff]  }
  0x59   :  { %320 = vmatprep.mubr.bf16.mxu1 %v3091_v1  ;;  %238 = vrot.lane.b32.xlu0 %v234_v2, %s3092_s4  ;;  %v3202_v5 = vld [vmem:[%s3802_s6 + $0x24] ss:$8 sps:$4 sm:$0xff]   ;;  %v3209_v6 = vld [vmem:[%s3802_s6 + $0x20] ss:$8 sps:$4 sm:$0xff]   ;;  %v128_v7 = vld [vmem:[#allocation8 + $0x8] sm:$0xff]  ;;  %vm136_vm1 = vcmask 130048  }
  0x5a   :  { %296 = vmatprep.subr.bf16.mxu1 %v3192_v3  ;;  %v127_v8 = vld [vmem:[#allocation8] sm:$0xff]  ;;  %v3215_v9 = vld [vmem:[%s3802_s6 + $0x14] ss:$8 sps:$4 sm:$0xff]   ;;  %2600 = vmatpush3.msra.mxu0 %v128_v7  ;;  %v126_v10 = vld [vmem:[#allocation2] sm:$0xff]  ;;  %vm241_vm2 = vcmask 261120   ;;  %vm284_vm3 = vcmask 523264  }
  0x5b   :  { %297 = vmatpush1.bf16.msra.mxu1 %v3197_v4  ;;  %2601 = vmatprep.subr.mxu0 %v3089_v0  ;;  %v235_v11 = vld [vmem:[#allocation7] sm:$0x1]  ;;  %v3222_v12 = vld [vmem:[%s3802_s6 + $0x10] ss:$8 sps:$4 sm:$0xff]   ;;  %v3229_v13 = vld [vmem:[%s3802_s6 + $0x4] ss:$8 sps:$4 sm:$0xff]  }
  0x5c   :  { %298 = vmatprep.subr.bf16.mxu1 %v3202_v5  ;;  %2602 = vmatpush3.msra.mxu0 %v127_v8  ;;  %v3239_v14 = vld [vmem:[%s3802_s6] ss:$8 sps:$4 sm:$0xff]   ;;  %v2464_v21 = vld [vmem:[#allocation10] ss:$0 sm:$0xff]  ;;  %s3093_s13 = smov 64   ;;  %vm2418_vm4 = vcmask 253952  }
  0x5d   :  { %2604 = vmatmul.mubr.msk.f32.vlgmr.msra.gmra.mxu0 %vm136_vm1, %v126_v10  ;;  %337 = vrot.lane.b32.xlu1 %v235_v11, %s3092_s4  ;;  %v233_v15 = vld [vmem:[#allocation5] sm:$0x1]  ;;  %v3266_v46 = vld [vmem:[#allocation11] ss:$0 sm:$0xff]  ;;  %v236_v10 = vld [vmem:[#allocation7 + $0x1] sm:$0x1] }
  0x5e   :  { %379 = vmatprep.subr.bf16.mxu0 %v3192_v3  ;;  %403 = vmatprep.mubr.bf16.mxu0 %v3091_v1  ;;  %v365_v48 = vrot.slane %v3266_v46, 1  ;;  %s3094_s2 = smov 16   ;;  %s3095_s1 = smov 96   ;;  %vm619_vm5 = vcmask 188416  }
  0x5f   :  { %299 = vmatpush1.bf16.msra.mxu1 %v3209_v6  ;;  %380 = vmatpush1.bf16.msra.mxu0 %v3197_v4  ;;  %s3097_s19 = smov [#allocation15]  }
  0x60   :  { %300 = vmatprep.subr.bf16.mxu1 %v3215_v9  ;;  %381 = vmatprep.subr.bf16.mxu0 %v3202_v5  ;;  %s2448_s20 = sshll.u32 %s3097_s19, 4  ;;  %s2449_s20 = int_to_ptr.vmem [resolvable:$true] %s2448_s20 }
  0x63   :  { %301 = vmatpush1.bf16.msra.mxu1 %v3222_v12  ;;  %382 = vmatpush1.bf16.msra.mxu0 %v3209_v6 }
  0x64   :  { %302 = vmatprep.subr.bf16.mxu1 %v3229_v13  ;;  %383 = vmatprep.subr.bf16.mxu0 %v3215_v9 }
  0x67   :  { %303 = vmatpush1.bf16.msra.mxu1 %v3239_v14  ;;  %384 = vmatpush1.bf16.msra.mxu0 %v3222_v12 }
  0x68   :  { %2606 = vmatprep.subr.mxu1 %v3089_v0  ;;  %385 = vmatprep.subr.bf16.mxu0 %v3229_v13 }
  0x6b   :  { %386 = vmatpush1.bf16.msra.mxu0 %v3239_v14 }
  0x6c   :  { %2617 = vmatprep.subr.mxu0 %v3089_v0 }
  0xcb   :  { %v239_v16 = vpop.permute.xlu0 %238 }
  0xcc   :  { %v242_v17 = vsel %vm241_vm2, %v233_v15, %v239_v16 }
  0xcd   :  { %v243_v18 = vpack.c.bf16 %v242_v17, %v242_v17 }
  0xcf   :  { %2475 = vmatmul.mubr.msk.bf16.vlgmr.msra.gmra.mxu1 %vm284_vm3, %v243_v18  ;;  %v338_v36 = vpop.permute.xlu1 %337 }
  0xd0   :  { %2614 = vmatprep.mubr.msk.f32.mxu1 %vm3090_vm0, %v3089_v0 }
 0x11d   :  { %v206_v19 = vpop.f32.mrf.mxu0 }
 0x11e   :  { %v3255_v22 = vadd.f32 %v2464_v21, %v206_v19 }
 0x11f   :  { %v2605_v20 = vpop.f32.mrf.mxu0 }
 0x120   :  { %v364_v47 = vrot.slane %v3255_v22, 1 }
 0x18f   :  { %v322_v23 = vpop.f32.mrf.mxu1 }
 0x190   :  { %v323_v24 = vadd.f32 %v322_v23, %v3255_v22 }
 0x191   :  { %v324_v25 = vpop.f32.mrf.mxu1 }
 0x192   :  { %v2476_v26 = vmul.f32 -1.442695, %v323_v24 }
 0x193   :  { %v325_v27 = vpop.f32.mrf.mxu1 }
 0x194   :  { %2780 = vpow2.f32 %v2476_v26  ;;  %v3284_v26 = vld [vmem:[%s3803_s7 + $0x18] sm:$0xff]  ;;  %v3289_v27 = vld [vmem:[%s3803_s7 + $0x10] sm:$0xff] }
 0x195   :  { %v326_v28 = vpop.f32.mrf.mxu1  ;;  %2607 = vmatpush3.msra.mxu1 %v3284_v26 }
 0x196   :  { %2608 = vmatprep.subr.mxu1 %v3089_v0  ;;  %v3296_v28 = vld [vmem:[%s3803_s7 + $0x8] sm:$0xff] }
 0x197   :  { %2609 = vmatpush3.msra.mxu1 %v3289_v27 }
 0x198   :  { %2610 = vmatprep.subr.mxu1 %v3089_v0 }
 0x199   :  { %2611 = vmatpush3.msra.mxu1 %v3296_v28 }
 0x19a   :  { %2612 = vmatprep.subr.mxu1 %v3089_v0 }
 0x1a1   :  { %v2781_v29 = vpop.eup %2780 }
 0x1a2   :  { %v331_v30 = vadd.f32 1.0, %v2781_v29 }
 0x1a4   :  { %2782 = vrcp.f32 %v331_v30 }
 0x1b1   :  { %v2783_v31 = vpop.eup %2782 }
 0x1b2   :  { %v334_v32 = vmul.f32 2.0, %v2783_v31  ;;  %v340_v37 = vmul.f32 %v2783_v31, %v338_v36 }
 0x1b4   :  { %v2477_v33 = vadd.f32 -1.0, %v334_v32 }
 0x1b6   :  { %342 = vrot.lane.b32.xlu0 %v2477_v33, %s3093_s13 }
 0x228   :  { %v343_v34 = vpop.permute.xlu0 %342 }
 0x229   :  { %v345_v35 = vmul.f32 %v2783_v31, %v343_v34 }
 0x22b   :  { %347 = vrot.lane.b32.xlu1 %v345_v35, %s3092_s4 }
 0x29d   :  { %v348_v38 = vpop.permute.xlu1 %347 }
 0x29e   :  { %v350_v39 = vadd.f32 %v348_v38, %v340_v37 }
 0x2a0   :  { %2784 = vtanh.f32 %v350_v39 }
 0x2ad   :  { %v2785_v40 = vpop.eup %2784 }
 0x2ae   :  { %353 = vrot.lane.b32.xlu0 %v2785_v40, %s3093_s13 }
 0x320   :  { %v354_v41 = vpop.permute.xlu0 %353 }
 0x321   :  { %v356_v42 = vmul.f32 %v2783_v31, %v354_v41  ;;  %v3307_v31 = vld [vmem:[%s3803_s7] sm:$0xff]  ;;  %v3339_v41 = vld [vmem:[%s3805_s9 + $0x8] sm:$0xff] }
 0x322   :  { %2613 = vmatpush3.msra.mxu1 %v3307_v31 }
 0x323   :  { %358 = vrot.lane.b32.xlu1 %v356_v42, %s3092_s4  ;;  %645 = vmatprep.subr.bf16.mxu1 %v3192_v3  ;;  %v3346_v42 = vld [vmem:[%s3805_s9] sm:$0xff] }
 0x395   :  { %v359_v43 = vpop.permute.xlu1 %358 }
 0x396   :  { %v361_v44 = vsel %vm241_vm2, %v359_v43, %v239_v16  ;;  %v3350_v43 = vld [vmem:[#allocation13] sm:$0x1] }
 0x397   :  { %v362_v45 = vpack.c.bf16 %v361_v44, %v361_v44 }
 0x399   :  { %2478 = vmatmul.mubr.msk.bf16.vlgmr.msra.gmra.mxu0 %vm284_vm3, %v362_v45 }
 0x39a   :  { %2621 = vmatprep.mubr.msk.f32.mxu0 %vm3090_vm0, %v3089_v0  ;;  %2618 = vmatpush3.msra.mxu0 %v3339_v41 }
 0x39b   :  { %2619 = vmatprep.subr.mxu0 %v3089_v0 }
 0x39c   :  { %2620 = vmatpush3.msra.mxu0 %v3346_v42 }
 0x39d   :  { %2624 = vmatprep.subr.mxu0 %v3089_v0 }
 0x459   :  { %v405_v49 = vpop.f32.mrf.mxu0 }
 0x45a   :  { %v406_v50 = vadd.f32 %v405_v49, %v364_v47 }
 0x45b   :  { %v407_v51 = vpop.f32.mrf.mxu0 }
 0x45c   :  { %v2479_v52 = vmul.f32 -1.442695, %v406_v50  ;;  %v408_v53 = vadd.f32 %v407_v51, %v365_v48  ;;  %v631_v48 = vrot.slane %v3266_v46, 2 }
 0x45d   :  { %v409_v54 = vpop.f32.mrf.mxu0 }
 0x45e   :  { %2786 = vpow2.f32 %v2479_v52  ;;  %v2480_v55 = vmul.f32 -1.442695, %v408_v53 }
 0x45f   :  { %v410_v56 = vpop.f32.mrf.mxu0 }
 0x460   :  { %2788 = vpow2.f32 %v2480_v55 }
 0x46b   :  { %v2787_v57 = vpop.eup %2786 }
 0x46c   :  { %v418_v58 = vadd.f32 1.0, %v2787_v57 }
 0x46d   :  { %v2789_v59 = vpop.eup %2788 }
 0x46e   :  { %2790 = vrcp.f32 %v418_v58  ;;  %v419_v60 = vadd.f32 1.0, %v2789_v59 }
 0x470   :  { %2792 = vrcp.f32 %v419_v60 }
 0x47b   :  { %v2791_v61 = vpop.eup %2790 }
 0x47c   :  { %v424_v62 = vmul.f32 2.0, %v2791_v61  ;;  %v426_v19 = vmul.f32 %v2791_v61, %v350_v39 }
 0x47d   :  { %v2793_v63 = vpop.eup %2792 }
 0x47e   :  { %v2481_v2 = vadd.f32 -1.0, %v424_v62  ;;  %v443_v7 = vmul.f32 2.0, %v2793_v63 }
 0x480   :  { %428 = vrot.lane.b32.xlu1 %v2481_v2, %s3093_s13  ;;  %v2482_v8 = vadd.f32 -1.0, %v443_v7  ;;  %v630_v2 = vrot.slane %v3255_v22, 2 }
 0x482   :  { %451 = vrot.lane.b32.xlu0 %v2482_v8, %s3093_s13 }
 0x486   :  { %446 = vrot.lane.b32.xlu0 %v236_v10, %s3092_s4 }
 0x4f2   :  { %v429_v11 = vpop.permute.xlu1 %428 }
 0x4f3   :  { %v431_v15 = vmul.f32 %v2791_v61, %v429_v11 }
 0x4f4   :  { %v452_v16 = vpop.permute.xlu0 %451 }
 0x4f5   :  { %v454_v17 = vmul.f32 %v2793_v63, %v452_v16  ;;  %433 = vrot.lane.b32.xlu0 %v431_v15, %s3092_s4 }
 0x4f7   :  { %456 = vrot.lane.b32.xlu1 %v454_v17, %s3092_s4 }
 0x4f8   :  { %v447_v18 = vpop.permute.xlu0 %446 }
 0x4f9   :  { %v449_v21 = vmul.f32 %v2793_v63, %v447_v18 }
 0x567   :  { %v434_v20 = vpop.permute.xlu0 %433 }
 0x568   :  { %v3275_v23 = vadd.f32 %v434_v20, %v426_v19 }
 0x569   :  { %v457_v24 = vpop.permute.xlu1 %456 }
 0x56a   :  { %2794 = vtanh.f32 %v3275_v23  ;;  %v3278_v25 = vadd.f32 %v457_v24, %v449_v21 }
 0x56c   :  { %2796 = vtanh.f32 %v3278_v25 }
 0x577   :  { %v2795_v29 = vpop.eup %2794 }
 0x578   :  { %439 = vrot.lane.b32.xlu0 %v2795_v29, %s3093_s13 }
 0x579   :  { %v2797_v30 = vpop.eup %2796 }
 0x57a   :  { %462 = vrot.lane.b32.xlu1 %v2797_v30, %s3093_s13 }
 0x5ea   :  { %v440_v32 = vpop.permute.xlu0 %439 }
 0x5eb   :  { %v442_v33 = vmul.f32 %v2791_v61, %v440_v32 }
 0x5ec   :  { %v463_v34 = vpop.permute.xlu1 %462 }
 0x5ed   :  { %v465_v35 = vmul.f32 %v2793_v63, %v463_v34  ;;  %622 = vrot.lane.b32.xlu0 %v442_v33, %s3092_s4 }
 0x5ef   :  { %467 = vrot.lane.b32.xlu1 %v465_v35, %s3092_s4 }
 0x5f3   :  { %625 = vrot.lane.b32.xlu1 %v465_v35, %s3093_s13 }
 0x65f   :  { %v623_v38 = vpop.permute.xlu0 %622 }
 0x661   :  { %v468_v36 = vpop.permute.xlu1 %467 }
 0x662   :  { %2615 = vmatmul.mubr.msk.f32.vlgmr.msra.gmra.mxu1 %vm241_vm2, %v468_v36 }
 0x663   :  { %646 = vmatpush1.bf16.msra.mxu1 %v3197_v4  ;;  %669 = vmatprep.mubr.bf16.mxu1 %v3091_v1 }
 0x664   :  { %647 = vmatprep.subr.bf16.mxu1 %v3202_v5 }
 0x665   :  { %v626_v37 = vpop.permute.xlu1 %625 }
 0x666   :  { %v628_v39 = vsel %vm241_vm2, %v623_v38, %v626_v37 }
 0x667   :  { %648 = vmatpush1.bf16.msra.mxu1 %v3209_v6  ;;  %v629_v40 = vpack.c.bf16 %v628_v39, %v628_v39 }
 0x668   :  { %649 = vmatprep.subr.bf16.mxu1 %v3215_v9 }
 0x66b   :  { %650 = vmatpush1.bf16.msra.mxu1 %v3222_v12 }
 0x66c   :  { %651 = vmatprep.subr.bf16.mxu1 %v3229_v13 }
 0x66f   :  { %652 = vmatpush1.bf16.msra.mxu1 %v3239_v14 }
 0x670   :  { %2642 = vmatprep.subr.mxu1 %v3089_v0 }
 0x672   :  { %2485 = vmatmul.mubr.msk.bf16.vlgmr.msra.gmra.mxu1 %vm284_vm3, %v629_v40 }
 0x673   :  { %2643 = vmatpush3.msra.mxu1 %v3284_v26  ;;  %2650 = vmatprep.mubr.msk.f32.mxu1 %vm3090_vm0, %v3089_v0 }
 0x674   :  { %2644 = vmatprep.subr.mxu1 %v3089_v0 }
 0x675   :  { %2645 = vmatpush3.msra.mxu1 %v3289_v27 }
 0x676   :  { %2646 = vmatprep.subr.mxu1 %v3089_v0 }
 0x677   :  { %2647 = vmatpush3.msra.mxu1 %v3296_v28 }
 0x678   :  { %2648 = vmatprep.subr.mxu1 %v3089_v0 }
 0x679   :  { %2649 = vmatpush3.msra.mxu1 %v3307_v31 }
 0x67a   :  { %2653 = vmatprep.subr.mxu1 %v3089_v0 }
 0x722   :  { %v537_v44 = vpop.f32.mrf.mxu1 }
 0x723   :  { %v3353_v45 = vadd.f32 %v537_v44, %v3350_v43 }
 0x724   :  { %v2616_v47 = vpop.f32.mrf.mxu1 }
 0x725   :  { %2622 = vmatmul.mubr.msk.f32.vlgmr.msra.gmra.mxu0 %vm136_vm1, %v3353_v45 }
 0x726   :  { %2625 = vmatpush3.msra.mxu0 %v3284_v26  ;;  %2632 = vmatprep.mubr.msk.f32.mxu0 %vm3090_vm0, %v3089_v0 }
 0x727   :  { %2626 = vmatprep.subr.mxu0 %v3089_v0 }
 0x728   :  { %2627 = vmatpush3.msra.mxu0 %v3289_v27 }
 0x729   :  { %2628 = vmatprep.subr.mxu0 %v3089_v0 }
 0x72a   :  { %2629 = vmatpush3.msra.mxu0 %v3296_v28 }
 0x72b   :  { %2630 = vmatprep.subr.mxu0 %v3089_v0 }
 0x72c   :  { %2631 = vmatpush3.msra.mxu0 %v3307_v31 }
 0x72d   :  { %2635 = vmatprep.subr.mxu0 %v3089_v0 }
 0x732   :  { %v671_v49 = vpop.f32.mrf.mxu1 }
 0x733   :  { %v672_v7 = vadd.f32 %v671_v49, %v630_v2 }
 0x734   :  { %v673_v50 = vpop.f32.mrf.mxu1 }
 0x735   :  { %v674_v51 = vadd.f32 %v673_v50, %v631_v48  ;;  %v2486_v8 = vmul.f32 -1.442695, %v672_v7 }
 0x736   :  { %v675_v52 = vpop.f32.mrf.mxu1 }
 0x737   :  { %v2487_v53 = vmul.f32 -1.442695, %v674_v51  ;;  %v892_v52 = vrot.slane %v3266_v46, 3 }
 0x738   :  { %v676_v54 = vpop.f32.mrf.mxu1 }
 0x739   :  { %2798 = vpow2.f32 %v2487_v53 }
 0x746   :  { %v2799_v55 = vpop.eup %2798 }
 0x747   :  { %v685_v56 = vadd.f32 1.0, %v2799_v55 }
 0x749   :  { %2800 = vrcp.f32 %v685_v56 }
 0x74a   :  { %2802 = vpow2.f32 %v2486_v8 }
 0x756   :  { %v2801_v57 = vpop.eup %2800 }
 0x757   :  { %v709_v58 = vmul.f32 2.0, %v2801_v57  ;;  %v2803_v10 = vpop.eup %2802  ;;  %v711_v15 = vmul.f32 %v2801_v57, %v3278_v25 }
 0x758   :  { %v684_v11 = vadd.f32 1.0, %v2803_v10  ;;  %v891_v10 = vrot.slane %v3255_v22, 3 }
 0x759   :  { %v2489_v59 = vadd.f32 -1.0, %v709_v58 }
 0x75a   :  { %2804 = vrcp.f32 %v684_v11 }
 0x75b   :  { %713 = vrot.lane.b32.xlu0 %v2489_v59, %s3093_s13 }
 0x767   :  { %v2805_v18 = vpop.eup %2804 }
 0x768   :  { %v690_v19 = vmul.f32 2.0, %v2805_v18  ;;  %v692_v33 = vmul.f32 %v2805_v18, %v3275_v23 }
 0x76a   :  { %v2488_v21 = vadd.f32 -1.0, %v690_v19 }
 0x7cd   :  { %v714_v60 = vpop.permute.xlu0 %713 }
 0x7ce   :  { %v716_v61 = vmul.f32 %v2801_v57, %v714_v60 }
 0x7d0   :  { %718 = vrot.lane.b32.xlu1 %v716_v61, %s3092_s4 }
 0x7e5   :  { %v3370_v62 = vpop.f32.mrf.mxu0 }
 0x7e7   :  { %v2623_v63 = vpop.f32.mrf.mxu0 }
 0x842   :  { %v719_v16 = vpop.permute.xlu1 %718 }
 0x843   :  { %v3374_v17 = vadd.f32 %v719_v16, %v711_v15 }
 0x845   :  { %2806 = vtanh.f32 %v3374_v17 }
 0x852   :  { %v2807_v20 = vpop.eup %2806 }
 0x853   :  { %724 = vrot.lane.b32.xlu0 %v2807_v20, %s3093_s13 }
 0x857   :  { %694 = vrot.lane.b32.xlu0 %v2488_v21, %s3093_s13 }
 0x8c5   :  { %v725_v24 = vpop.permute.xlu0 %724 }
 0x8c6   :  { %v727_v29 = vmul.f32 %v2801_v57, %v725_v24 }
 0x8c8   :  { %729 = vrot.lane.b32.xlu1 %v727_v29, %s3092_s4 }
 0x8c9   :  { %v695_v30 = vpop.permute.xlu0 %694 }
 0x8ca   :  { %v697_v32 = vmul.f32 %v2805_v18, %v695_v30 }
 0x8cc   :  { %699 = vrot.lane.b32.xlu1 %v697_v32, %s3092_s4 }
 0x93a   :  { %v730_v25 = vpop.permute.xlu1 %729 }
 0x93b   :  { %2633 = vmatmul.mubr.msk.f32.vlgmr.msra.gmra.mxu0 %vm241_vm2, %v730_v25 }
 0x93c   :  { %2636 = vmatpush3.msra.mxu0 %v3339_v41  ;;  %2639 = vmatprep.mubr.msk.f32.mxu0 %vm3090_vm0, %v3089_v0 }
 0x93d   :  { %2637 = vmatprep.subr.mxu0 %v3089_v0 }
 0x93e   :  { %v700_v34 = vpop.permute.xlu1 %699  ;;  %2638 = vmatpush3.msra.mxu0 %v3346_v42 }
 0x93f   :  { %v3388_v35 = vadd.f32 %v700_v34, %v692_v33  ;;  %906 = vmatprep.subr.bf16.mxu0 %v3192_v3 }
 0x941   :  { %2808 = vtanh.f32 %v3388_v35 }
 0x94e   :  { %v2809_v36 = vpop.eup %2808 }
 0x94f   :  { %705 = vrot.lane.b32.xlu0 %v2809_v36, %s3093_s13 }
 0x953   :  { %886 = vrot.lane.b32.xlu0 %v727_v29, %s3093_s13 }
 0x9c1   :  { %v706_v37 = vpop.permute.xlu0 %705 }
 0x9c2   :  { %v708_v38 = vmul.f32 %v2805_v18, %v706_v37 }
 0x9c4   :  { %883 = vrot.lane.b32.xlu1 %v708_v38, %s3092_s4 }
 0x9c5   :  { %v887_v44 = vpop.permute.xlu0 %886 }
 0x9fb   :  { %v799_v23 = vpop.f32.mrf.mxu0 }
 0x9fc   :  { %v3396_v39 = vadd.f32 %v799_v23, %v3350_v43 }
 0x9fd   :  { %v2634_v40 = vpop.f32.mrf.mxu0 }
 0x9fe   :  { %2640 = vmatmul.mubr.msk.f32.vlgmr.msra.gmra.mxu0 %vm136_vm1, %v3396_v39 }
 0x9ff   :  { %907 = vmatpush1.bf16.msra.mxu0 %v3197_v4  ;;  %930 = vmatprep.mubr.bf16.mxu0 %v3091_v1 }
 0xa00   :  { %908 = vmatprep.subr.bf16.mxu0 %v3202_v5 }
 0xa03   :  { %909 = vmatpush1.bf16.msra.mxu0 %v3209_v6 }
 0xa04   :  { %910 = vmatprep.subr.bf16.mxu0 %v3215_v9 }
 0xa07   :  { %911 = vmatpush1.bf16.msra.mxu0 %v3222_v12 }
 0xa08   :  { %912 = vmatprep.subr.bf16.mxu0 %v3229_v13 }
 0xa0b   :  { %913 = vmatpush1.bf16.msra.mxu0 %v3239_v14 }
 0xa0c   :  { %2660 = vmatprep.subr.mxu0 %v3089_v0 }
 0xa36   :  { %v884_v47 = vpop.permute.xlu1 %883 }
 0xa37   :  { %v889_v48 = vsel %vm241_vm2, %v884_v47, %v887_v44 }
 0xa38   :  { %v890_v49 = vpack.c.bf16 %v889_v48, %v889_v48 }
 0xa3a   :  { %2492 = vmatmul.mubr.msk.bf16.vlgmr.msra.gmra.mxu0 %vm284_vm3, %v890_v49 }
 0xa3b   :  { %2661 = vmatpush3.msra.mxu0 %v3284_v26  ;;  %2668 = vmatprep.mubr.msk.f32.mxu0 %vm3090_vm0, %v3089_v0 }
 0xa3c   :  { %2662 = vmatprep.subr.mxu0 %v3089_v0 }
 0xa3d   :  { %2663 = vmatpush3.msra.mxu0 %v3289_v27 }
 0xa3e   :  { %2664 = vmatprep.subr.mxu0 %v3089_v0 }
 0xa3f   :  { %2665 = vmatpush3.msra.mxu0 %v3296_v28 }
 0xa40   :  { %2666 = vmatprep.subr.mxu0 %v3089_v0 }
 0xa41   :  { %2667 = vmatpush3.msra.mxu0 %v3307_v31 }
 0xa42   :  { %2671 = vmatprep.subr.mxu0 %v3089_v0 }
 0xabe   :  { %v3421_v50 = vpop.f32.mrf.mxu0 }
 0xac0   :  { %v2641_v51 = vpop.f32.mrf.mxu0 }
 0xafa   :  { %v932_v53 = vpop.f32.mrf.mxu0 }
 0xafb   :  { %v933_v11 = vadd.f32 %v932_v53, %v891_v10 }
 0xafc   :  { %v934_v54 = vpop.f32.mrf.mxu0 }
 0xafd   :  { %v935_v55 = vadd.f32 %v934_v54, %v892_v52  ;;  %v2493_v15 = vmul.f32 -1.442695, %v933_v11 }
 0xafe   :  { %v936_v56 = vpop.f32.mrf.mxu0 }
 0xaff   :  { %v2494_v57 = vmul.f32 -1.442695, %v935_v55 }
 0xb00   :  { %v937_v58 = vpop.f32.mrf.mxu0 }
 0xb01   :  { %2810 = vpow2.f32 %v2494_v57  ;;  %v1153_v57 = vrot.slane %v3266_v46, 4 }
 0xb0e   :  { %v2811_v59 = vpop.eup %2810 }
 0xb0f   :  { %v946_v60 = vadd.f32 1.0, %v2811_v59 }
 0xb11   :  { %2812 = vrcp.f32 %v946_v60 }
 0xb12   :  { %2814 = vpow2.f32 %v2493_v15 }
 0xb1e   :  { %v2813_v61 = vpop.eup %2812 }
 0xb1f   :  { %v970_v63 = vmul.f32 2.0, %v2813_v61  ;;  %v2815_v16 = vpop.eup %2814  ;;  %v972_v19 = vmul.f32 %v2813_v61, %v3374_v17 }
 0xb20   :  { %v945_v18 = vadd.f32 1.0, %v2815_v16 }
 0xb21   :  { %v2496_v2 = vadd.f32 -1.0, %v970_v63 }
 0xb22   :  { %2816 = vrcp.f32 %v945_v18 }
 0xb23   :  { %974 = vrot.lane.b32.xlu1 %v2496_v2, %s3093_s13 }
 0xb2f   :  { %v2817_v24 = vpop.eup %2816 }
 0xb30   :  { %v951_v29 = vmul.f32 2.0, %v2817_v24  ;;  %v953_v37 = vmul.f32 %v2817_v24, %v3388_v35 }
 0xb32   :  { %v2495_v32 = vadd.f32 -1.0, %v951_v29 }
 0xb95   :  { %v975_v7 = vpop.permute.xlu1 %974 }
 0xb96   :  { %v977_v8 = vmul.f32 %v2813_v61, %v975_v7 }
 0xb98   :  { %979 = vrot.lane.b32.xlu0 %v977_v8, %s3092_s4 }
 0xc0a   :  { %v980_v20 = vpop.permute.xlu0 %979 }
 0xc0b   :  { %v3428_v21 = vadd.f32 %v980_v20, %v972_v19  ;;  %v1152_v19 = vrot.slane %v3255_v22, 4 }
 0xc0d   :  { %2818 = vtanh.f32 %v3428_v21 }
 0xc1a   :  { %v2819_v30 = vpop.eup %2818 }
 0xc1b   :  { %985 = vrot.lane.b32.xlu1 %v2819_v30, %s3093_s13 }
 0xc1f   :  { %955 = vrot.lane.b32.xlu1 %v2495_v32, %s3093_s13 }
 0xc8d   :  { %v986_v25 = vpop.permute.xlu1 %985 }
 0xc8e   :  { %v988_v33 = vmul.f32 %v2813_v61, %v986_v25 }
 0xc90   :  { %990 = vrot.lane.b32.xlu0 %v988_v33, %s3092_s4 }
 0xc91   :  { %v956_v34 = vpop.permute.xlu1 %955 }
 0xc92   :  { %v958_v36 = vmul.f32 %v2817_v24, %v956_v34 }
 0xc94   :  { %960 = vrot.lane.b32.xlu0 %v958_v36, %s3092_s4 }
 0xd02   :  { %v991_v17 = vpop.permute.xlu0 %990 }
 0xd03   :  { %2651 = vmatmul.mubr.msk.f32.vlgmr.msra.gmra.mxu1 %vm241_vm2, %v991_v17 }
 0xd04   :  { %2654 = vmatpush3.msra.mxu1 %v3339_v41  ;;  %2657 = vmatprep.mubr.msk.f32.mxu1 %vm3090_vm0, %v3089_v0 }
 0xd05   :  { %2655 = vmatprep.subr.mxu1 %v3089_v0 }
 0xd06   :  { %v961_v38 = vpop.permute.xlu0 %960  ;;  %2656 = vmatpush3.msra.mxu1 %v3346_v42 }
 0xd07   :  { %v3442_v23 = vadd.f32 %v961_v38, %v953_v37  ;;  %1167 = vmatprep.subr.bf16.mxu1 %v3192_v3 }
 0xd09   :  { %2820 = vtanh.f32 %v3442_v23 }
 0xd16   :  { %v2821_v40 = vpop.eup %2820 }
 0xd17   :  { %966 = vrot.lane.b32.xlu1 %v2821_v40, %s3093_s13 }
 0xd1b   :  { %1147 = vrot.lane.b32.xlu1 %v988_v33, %s3093_s13 }
 0xd89   :  { %v967_v44 = vpop.permute.xlu1 %966 }
 0xd8a   :  { %v969_v47 = vmul.f32 %v2817_v24, %v967_v44 }
 0xd8c   :  { %1144 = vrot.lane.b32.xlu0 %v969_v47, %s3092_s4 }
 0xd8d   :  { %v1148_v51 = vpop.permute.xlu1 %1147 }
 0xdc3   :  { %v1060_v35 = vpop.f32.mrf.mxu1 }
 0xdc4   :  { %v3450_v48 = vadd.f32 %v1060_v35, %v3350_v43 }
 0xdc5   :  { %v2652_v49 = vpop.f32.mrf.mxu1 }
 0xdc6   :  { %2658 = vmatmul.mubr.msk.f32.vlgmr.msra.gmra.mxu1 %vm136_vm1, %v3450_v48 }
 0xdc7   :  { %1168 = vmatpush1.bf16.msra.mxu1 %v3197_v4  ;;  %1191 = vmatprep.mubr.bf16.mxu1 %v3091_v1 }
 0xdc8   :  { %1169 = vmatprep.subr.bf16.mxu1 %v3202_v5 }
 0xdcb   :  { %1170 = vmatpush1.bf16.msra.mxu1 %v3209_v6 }
 0xdcc   :  { %1171 = vmatprep.subr.bf16.mxu1 %v3215_v9 }
 0xdcf   :  { %1172 = vmatpush1.bf16.msra.mxu1 %v3222_v12 }
 0xdd0   :  { %1173 = vmatprep.subr.bf16.mxu1 %v3229_v13 }
 0xdd3   :  { %1174 = vmatpush1.bf16.msra.mxu1 %v3239_v14 }
 0xdd4   :  { %2678 = vmatprep.subr.mxu1 %v3089_v0 }
 0xdfe   :  { %v1145_v52 = vpop.permute.xlu0 %1144 }
 0xdff   :  { %v1150_v53 = vsel %vm241_vm2, %v1145_v52, %v1148_v51 }
 0xe00   :  { %v1151_v54 = vpack.c.bf16 %v1150_v53, %v1150_v53 }
 0xe02   :  { %2499 = vmatmul.mubr.msk.bf16.vlgmr.msra.gmra.mxu1 %vm284_vm3, %v1151_v54 }
 0xe03   :  { %2679 = vmatpush3.msra.mxu1 %v3284_v26  ;;  %2686 = vmatprep.mubr.msk.f32.mxu1 %vm3090_vm0, %v3089_v0 }
 0xe04   :  { %2680 = vmatprep.subr.mxu1 %v3089_v0 }
 0xe05   :  { %2681 = vmatpush3.msra.mxu1 %v3289_v27 }
 0xe06   :  { %2682 = vmatprep.subr.mxu1 %v3089_v0 }
 0xe07   :  { %2683 = vmatpush3.msra.mxu1 %v3296_v28 }
 0xe08   :  { %2684 = vmatprep.subr.mxu1 %v3089_v0 }
 0xe09   :  { %2685 = vmatpush3.msra.mxu1 %v3307_v31 }
 0xe0a   :  { %2689 = vmatprep.subr.mxu1 %v3089_v0 }
 0xe86   :  { %v3475_v55 = vpop.f32.mrf.mxu1 }
 0xe88   :  { %v2659_v56 = vpop.f32.mrf.mxu1 }
 0xec2   :  { %v1193_v58 = vpop.f32.mrf.mxu1 }
 0xec3   :  { %v1194_v20 = vadd.f32 %v1193_v58, %v1152_v19 }
 0xec4   :  { %v1195_v59 = vpop.f32.mrf.mxu1 }
 0xec5   :  { %v1196_v60 = vadd.f32 %v1195_v59, %v1153_v57  ;;  %v2500_v24 = vmul.f32 -1.442695, %v1194_v20 }
 0xec6   :  { %v1197_v61 = vpop.f32.mrf.mxu1 }
 0xec7   :  { %v2501_v63 = vmul.f32 -1.442695, %v1196_v60 }
 0xec8   :  { %v1198_v2 = vpop.f32.mrf.mxu1 }
 0xec9   :  { %2822 = vpow2.f32 %v2501_v63 }
 0xed6   :  { %v2823_v7 = vpop.eup %2822 }
 0xed7   :  { %v1207_v8 = vadd.f32 1.0, %v2823_v7 }
 0xed9   :  { %2824 = vrcp.f32 %v1207_v8 }
 0xeda   :  { %2826 = vpow2.f32 %v2500_v24  ;;  %v1413_v24 = vrot.slane %v3255_v22, 5 }
 0xee6   :  { %v2825_v10 = vpop.eup %2824 }
 0xee7   :  { %v1231_v11 = vmul.f32 2.0, %v2825_v10  ;;  %v2827_v29 = vpop.eup %2826  ;;  %v1233_v32 = vmul.f32 %v2825_v10, %v3428_v21 }
 0xee8   :  { %v1206_v30 = vadd.f32 1.0, %v2827_v29 }
 0xee9   :  { %v2503_v15 = vadd.f32 -1.0, %v1231_v11 }
 0xeea   :  { %2828 = vrcp.f32 %v1206_v30 }
 0xeeb   :  { %1235 = vrot.lane.b32.xlu0 %v2503_v15, %s3093_s13 }
 0xef7   :  { %v2829_v34 = vpop.eup %2828 }
 0xef8   :  { %v1212_v36 = vmul.f32 2.0, %v2829_v34  ;;  %v1214_v35 = vmul.f32 %v2829_v34, %v3442_v23 }
 0xefa   :  { %v2502_v37 = vadd.f32 -1.0, %v1212_v36 }
 0xf5d   :  { %v1236_v16 = vpop.permute.xlu0 %1235 }
 0xf5e   :  { %v1238_v18 = vmul.f32 %v2825_v10, %v1236_v16 }
 0xf60   :  { %1240 = vrot.lane.b32.xlu1 %v1238_v18, %s3092_s4 }
 0xfd2   :  { %v1241_v25 = vpop.permute.xlu1 %1240 }
 0xfd3   :  { %v3482_v33 = vadd.f32 %v1241_v25, %v1233_v32 }
 0xfd5   :  { %2830 = vtanh.f32 %v3482_v33 }
 0xfe2   :  { %v2831_v17 = vpop.eup %2830 }
 0xfe3   :  { %1246 = vrot.lane.b32.xlu0 %v2831_v17, %s3093_s13 }
 0xfe7   :  { %1216 = vrot.lane.b32.xlu0 %v2502_v37, %s3093_s13 }
0x1055   :  { %v1247_v38 = vpop.permute.xlu0 %1246 }
0x1056   :  { %v1249_v40 = vmul.f32 %v2825_v10, %v1247_v38 }
0x1058   :  { %1251 = vrot.lane.b32.xlu1 %v1249_v40, %s3092_s4 }
0x1059   :  { %v1217_v44 = vpop.permute.xlu0 %1216 }
0x105a   :  { %v1219_v47 = vmul.f32 %v2829_v34, %v1217_v44 }
0x105c   :  { %1221 = vrot.lane.b32.xlu1 %v1219_v47, %s3092_s4 }
0x10ca   :  { %v1252_v21 = vpop.permute.xlu1 %1251 }
0x10cb   :  { %2669 = vmatmul.mubr.msk.f32.vlgmr.msra.gmra.mxu0 %vm241_vm2, %v1252_v21 }
0x10cc   :  { %2672 = vmatpush3.msra.mxu0 %v3339_v41  ;;  %2675 = vmatprep.mubr.msk.f32.mxu0 %vm3090_vm0, %v3089_v0 }
0x10cd   :  { %2673 = vmatprep.subr.mxu0 %v3089_v0 }
0x10ce   :  { %v1222_v49 = vpop.permute.xlu1 %1221  ;;  %2674 = vmatpush3.msra.mxu0 %v3346_v42 }
0x10cf   :  { %v3496_v51 = vadd.f32 %v1222_v49, %v1214_v35  ;;  %1428 = vmatprep.subr.bf16.mxu0 %v3192_v3 }
0x10d1   :  { %2832 = vtanh.f32 %v3496_v51 }
0x10de   :  { %v2833_v52 = vpop.eup %2832 }
0x10df   :  { %1227 = vrot.lane.b32.xlu0 %v2833_v52, %s3093_s13 }
0x10e3   :  { %1408 = vrot.lane.b32.xlu0 %v1249_v40, %s3093_s13 }
0x1151   :  { %v1228_v53 = vpop.permute.xlu0 %1227 }
0x1152   :  { %v1230_v54 = vmul.f32 %v2829_v34, %v1228_v53 }
0x1154   :  { %1405 = vrot.lane.b32.xlu1 %v1230_v54, %s3092_s4 }
0x1155   :  { %v1409_v3 = vpop.permute.xlu0 %1408 }
0x118b   :  { %v1321_v23 = vpop.f32.mrf.mxu0 }
0x118c   :  { %v3504_v56 = vadd.f32 %v1321_v23, %v3350_v43  ;;  %v3555_v23 = vld [vmem:[%s3802_s6 + $0x34] ss:$8 sps:$4 sm:$0xff]  }
0x118d   :  { %v2670_v57 = vpop.f32.mrf.mxu0 }
0x118e   :  { %2676 = vmatmul.mubr.msk.f32.vlgmr.msra.gmra.mxu0 %vm136_vm1, %v3504_v56 }
0x118f   :  { %1429 = vmatpush1.bf16.msra.mxu0 %v3197_v4  ;;  %1452 = vmatprep.mubr.bf16.mxu0 %v3091_v1 }
0x1190   :  { %1430 = vmatprep.subr.bf16.mxu0 %v3202_v5 }
0x1193   :  { %1431 = vmatpush1.bf16.msra.mxu0 %v3209_v6 }
0x1194   :  { %1432 = vmatprep.subr.bf16.mxu0 %v3215_v9  ;;  %v1414_v9 = vrot.slane %v3266_v46, 5 }
0x1197   :  { %1433 = vmatpush1.bf16.msra.mxu0 %v3222_v12 }
0x1198   :  { %1434 = vmatprep.subr.bf16.mxu0 %v3229_v13 }
0x119b   :  { %1435 = vmatpush1.bf16.msra.mxu0 %v3239_v14 }
0x119c   :  { %2696 = vmatprep.subr.mxu0 %v3089_v0 }
0x11c6   :  { %v1406_v58 = vpop.permute.xlu1 %1405 }
0x11c7   :  { %v1411_v4 = vsel %vm241_vm2, %v1406_v58, %v1409_v3 }
0x11c8   :  { %v1412_v59 = vpack.c.bf16 %v1411_v4, %v1411_v4 }
0x11ca   :  { %2506 = vmatmul.mubr.msk.bf16.vlgmr.msra.gmra.mxu0 %vm284_vm3, %v1412_v59 }
0x11cb   :  { %2697 = vmatpush3.msra.mxu0 %v3284_v26  ;;  %2704 = vmatprep.mubr.msk.f32.mxu0 %vm3090_vm0, %v3089_v0 }
0x11cc   :  { %2698 = vmatprep.subr.mxu0 %v3089_v0 }
0x11cd   :  { %2699 = vmatpush3.msra.mxu0 %v3289_v27 }
0x11ce   :  { %2700 = vmatprep.subr.mxu0 %v3089_v0 }
0x11cf   :  { %2701 = vmatpush3.msra.mxu0 %v3296_v28 }
0x11d0   :  { %2702 = vmatprep.subr.mxu0 %v3089_v0 }
0x11d1   :  { %2703 = vmatpush3.msra.mxu0 %v3307_v31 }
0x11d2   :  { %2707 = vmatprep.subr.mxu0 %v3089_v0 }
0x124e   :  { %v3529_v5 = vpop.f32.mrf.mxu0 }
0x1250   :  { %v2677_v6 = vpop.f32.mrf.mxu0 }
0x1251   :  { %v3570_v6 = vld [vmem:[%s3802_s6 + $0x30] ss:$8 sps:$4 sm:$0xff]  }
0x128a   :  { %v1454_v60 = vpop.f32.mrf.mxu0 }
0x128b   :  { %v1455_v29 = vadd.f32 %v1454_v60, %v1413_v24  ;;  %v3583_v60 = vld [vmem:[%s3802_s6 + $0x20] ss:$8 sps:$4 sm:$0xff]  }
0x128c   :  { %v1456_v61 = vpop.f32.mrf.mxu0 }
0x128d   :  { %v1457_v63 = vadd.f32 %v1456_v61, %v1414_v9  ;;  %v2507_v30 = vmul.f32 -1.442695, %v1455_v29  ;;  %v3577_v9 = vld [vmem:[%s3802_s6 + $0x24] ss:$8 sps:$4 sm:$0xff]   ;;  %v3589_v61 = vld [vmem:[%s3802_s6 + $0x14] ss:$8 sps:$4 sm:$0xff]  }
0x128e   :  { %v1458_v2 = vpop.f32.mrf.mxu0 }
0x128f   :  { %v2508_v7 = vmul.f32 -1.442695, %v1457_v63 }
0x1290   :  { %v1459_v8 = vpop.f32.mrf.mxu0 }
0x1291   :  { %2834 = vpow2.f32 %v2508_v7 }
0x129e   :  { %v2835_v10 = vpop.eup %2834 }
0x129f   :  { %v1468_v11 = vadd.f32 1.0, %v2835_v10 }
0x12a1   :  { %2836 = vrcp.f32 %v1468_v11 }
0x12a2   :  { %2838 = vpow2.f32 %v2507_v30 }
0x12ae   :  { %v2837_v15 = vpop.eup %2836 }
0x12af   :  { %v1492_v16 = vmul.f32 2.0, %v2837_v15  ;;  %v2839_v32 = vpop.eup %2838  ;;  %v1494_v34 = vmul.f32 %v2837_v15, %v3482_v33 }
0x12b0   :  { %v1467_v25 = vadd.f32 1.0, %v2839_v32 }
0x12b1   :  { %v2510_v18 = vadd.f32 -1.0, %v1492_v16 }
0x12b2   :  { %2840 = vrcp.f32 %v1467_v25 }
0x12b3   :  { %1496 = vrot.lane.b32.xlu1 %v2510_v18, %s3093_s13 }
0x12bf   :  { %v2841_v37 = vpop.eup %2840 }
0x12c0   :  { %v1473_v38 = vmul.f32 2.0, %v2841_v37  ;;  %v1475_v52 = vmul.f32 %v2841_v37, %v3496_v51 }
0x12c2   :  { %v2509_v44 = vadd.f32 -1.0, %v1473_v38 }
0x1325   :  { %v1497_v19 = vpop.permute.xlu1 %1496 }
0x1326   :  { %v1499_v20 = vmul.f32 %v2837_v15, %v1497_v19 }
0x1328   :  { %1501 = vrot.lane.b32.xlu0 %v1499_v20, %s3092_s4 }
0x139a   :  { %v1502_v36 = vpop.permute.xlu0 %1501 }
0x139b   :  { %v3536_v17 = vadd.f32 %v1502_v36, %v1494_v34 }
0x139d   :  { %2842 = vtanh.f32 %v3536_v17 }
0x13aa   :  { %v2843_v40 = vpop.eup %2842 }
0x13ab   :  { %1507 = vrot.lane.b32.xlu1 %v2843_v40, %s3093_s13 }
0x13af   :  { %1477 = vrot.lane.b32.xlu1 %v2509_v44, %s3093_s13 }
0x141d   :  { %v1508_v47 = vpop.permute.xlu1 %1507 }
0x141e   :  { %v1510_v21 = vmul.f32 %v2837_v15, %v1508_v47 }
0x1420   :  { %1512 = vrot.lane.b32.xlu0 %v1510_v21, %s3092_s4 }
0x1421   :  { %v1478_v35 = vpop.permute.xlu1 %1477 }
0x1422   :  { %v1480_v49 = vmul.f32 %v2841_v37, %v1478_v35 }
0x1424   :  { %1482 = vrot.lane.b32.xlu0 %v1480_v49, %s3092_s4 }
0x1492   :  { %v1513_v33 = vpop.permute.xlu0 %1512 }
0x1493   :  { %2687 = vmatmul.mubr.msk.f32.vlgmr.msra.gmra.mxu1 %vm241_vm2, %v1513_v33 }
0x1494   :  { %2690 = vmatpush3.msra.mxu1 %v3339_v41  ;;  %2693 = vmatprep.mubr.msk.f32.mxu1 %vm3090_vm0, %v3089_v0 }
0x1495   :  { %2691 = vmatprep.subr.mxu1 %v3089_v0 }
0x1496   :  { %v1483_v53 = vpop.permute.xlu0 %1482  ;;  %2692 = vmatpush3.msra.mxu1 %v3346_v42 }
0x1497   :  { %v3550_v54 = vadd.f32 %v1483_v53, %v1475_v52  ;;  %1689 = vmatprep.subr.bf16.mxu1 %v3555_v23 }
0x1499   :  { %2844 = vtanh.f32 %v3550_v54 }
0x14a6   :  { %v2845_v57 = vpop.eup %2844 }
0x14a7   :  { %1488 = vrot.lane.b32.xlu1 %v2845_v57, %s3093_s13 }
0x14ab   :  { %1669 = vrot.lane.b32.xlu1 %v1510_v21, %s3093_s13 }
0x1519   :  { %v1489_v51 = vpop.permute.xlu1 %1488 }
0x151a   :  { %v1491_v3 = vmul.f32 %v2841_v37, %v1489_v51 }
0x151c   :  { %1666 = vrot.lane.b32.xlu0 %v1491_v3, %s3092_s4 }
0x151d   :  { %v1670_v63 = vpop.permute.xlu1 %1669 }
0x1553   :  { %v1582_v58 = vpop.f32.mrf.mxu1 }
0x1554   :  { %v3563_v4 = vadd.f32 %v1582_v58, %v3350_v43 }
0x1555   :  { %v2688_v59 = vpop.f32.mrf.mxu1 }
0x1556   :  { %2694 = vmatmul.mubr.msk.f32.vlgmr.msra.gmra.mxu1 %vm136_vm1, %v3563_v4 }
0x1557   :  { %1690 = vmatpush1.bf16.msra.mxu1 %v3570_v6  ;;  %1713 = vmatprep.mubr.bf16.mxu1 %v3091_v1 }
0x1558   :  { %1691 = vmatprep.subr.bf16.mxu1 %v3577_v9 }
0x155b   :  { %1692 = vmatpush1.bf16.msra.mxu1 %v3583_v60 }
0x155c   :  { %1693 = vmatprep.subr.bf16.mxu1 %v3589_v61 }
0x155f   :  { %1694 = vmatpush1.bf16.msra.mxu1 %v3222_v12 }
0x1560   :  { %1695 = vmatprep.subr.bf16.mxu1 %v3229_v13 }
0x1563   :  { %1696 = vmatpush1.bf16.msra.mxu1 %v3239_v14  ;;  %v1675_v14 = vrot.slane %v3266_v46, 6  ;;  %v1674_v46 = vrot.slane %v3255_v22, 6 }
0x1564   :  { %2714 = vmatprep.subr.mxu1 %v3089_v0 }
0x158e   :  { %v1667_v2 = vpop.permute.xlu0 %1666 }
0x158f   :  { %v1672_v7 = vsel %vm241_vm2, %v1667_v2, %v1670_v63 }
0x1590   :  { %v1673_v8 = vpack.c.bf16 %v1672_v7, %v1672_v7 }
0x1592   :  { %2513 = vmatmul.mubr.msk.bf16.vlgmr.msra.gmra.mxu1 %vm284_vm3, %v1673_v8 }
0x1593   :  { %2715 = vmatpush3.msra.mxu1 %v3284_v26  ;;  %2722 = vmatprep.mubr.msk.f32.mxu1 %vm3090_vm0, %v3089_v0 }
0x1594   :  { %2716 = vmatprep.subr.mxu1 %v3089_v0 }
0x1595   :  { %2717 = vmatpush3.msra.mxu1 %v3289_v27 }
0x1596   :  { %2718 = vmatprep.subr.mxu1 %v3089_v0 }
0x1597   :  { %2719 = vmatpush3.msra.mxu1 %v3296_v28 }
0x1598   :  { %2720 = vmatprep.subr.mxu1 %v3089_v0 }
0x1599   :  { %2721 = vmatpush3.msra.mxu1 %v3307_v31 }
0x159a   :  { %2725 = vmatprep.subr.mxu1 %v3089_v0 }
0x1616   :  { %v3608_v12 = vpop.f32.mrf.mxu1 }
0x1618   :  { %v2695_v13 = vpop.f32.mrf.mxu1 }
0x1652   :  { %v1715_v10 = vpop.f32.mrf.mxu1 }
0x1653   :  { %v1716_v36 = vadd.f32 %v1715_v10, %v1674_v46  ;;  %v3649_v10 = vld [vmem:[%s3802_s6 + $0x10] ss:$8 sps:$4 sm:$0xff]  }
0x1654   :  { %v1717_v11 = vpop.f32.mrf.mxu1 }
0x1655   :  { %v1718_v15 = vadd.f32 %v1717_v11, %v1675_v14  ;;  %v2514_v37 = vmul.f32 -1.442695, %v1716_v36  ;;  %v3655_v11 = vld [vmem:[%s3802_s6 + $0x4] ss:$8 sps:$4 sm:$0xff]  }
0x1656   :  { %v1719_v16 = vpop.f32.mrf.mxu1 }
0x1657   :  { %v2515_v18 = vmul.f32 -1.442695, %v1718_v15  ;;  %v3661_v15 = vld [vmem:[%s3802_s6] ss:$8 sps:$4 sm:$0xff]  }
0x1658   :  { %v1720_v19 = vpop.f32.mrf.mxu1 }
0x1659   :  { %2846 = vpow2.f32 %v2515_v18 }
0x1666   :  { %v2847_v20 = vpop.eup %2846 }
0x1667   :  { %v1729_v24 = vadd.f32 1.0, %v2847_v20 }
0x1669   :  { %2848 = vrcp.f32 %v1729_v24 }
0x166a   :  { %2850 = vpow2.f32 %v2514_v37 }
0x1676   :  { %v2849_v29 = vpop.eup %2848 }
0x1677   :  { %v1753_v30 = vmul.f32 2.0, %v2849_v29  ;;  %v2851_v38 = vpop.eup %2850  ;;  %v1755_v44 = vmul.f32 %v2849_v29, %v3536_v17 }
0x1678   :  { %v1728_v40 = vadd.f32 1.0, %v2851_v38 }
0x1679   :  { %v2517_v32 = vadd.f32 -1.0, %v1753_v30 }
0x167a   :  { %2852 = vrcp.f32 %v1728_v40 }
0x167b   :  { %1757 = vrot.lane.b32.xlu0 %v2517_v32, %s3093_s13 }
0x1687   :  { %v2853_v35 = vpop.eup %2852 }
0x1688   :  { %v1734_v49 = vmul.f32 2.0, %v2853_v35  ;;  %v1736_v58 = vmul.f32 %v2853_v35, %v3550_v54 }
0x168a   :  { %v2516_v52 = vadd.f32 -1.0, %v1734_v49 }
0x16ed   :  { %v1758_v25 = vpop.permute.xlu0 %1757 }
0x16ee   :  { %v1760_v34 = vmul.f32 %v2849_v29, %v1758_v25 }
0x16f0   :  { %1762 = vrot.lane.b32.xlu1 %v1760_v34, %s3092_s4 }
0x1762   :  { %v1763_v47 = vpop.permute.xlu1 %1762 }
0x1763   :  { %v3615_v21 = vadd.f32 %v1763_v47, %v1755_v44 }
0x1765   :  { %2854 = vtanh.f32 %v3615_v21 }
0x1772   :  { %v2855_v33 = vpop.eup %2854 }
0x1773   :  { %1768 = vrot.lane.b32.xlu0 %v2855_v33, %s3093_s13 }
0x1777   :  { %1738 = vrot.lane.b32.xlu0 %v2516_v52, %s3093_s13 }
0x17e5   :  { %v1769_v53 = vpop.permute.xlu0 %1768 }
0x17e6   :  { %v1771_v57 = vmul.f32 %v2849_v29, %v1769_v53  ;;  %v3679_v29 = vld [vmem:[#allocation11] ss:$0 sm:$0xff] }
0x17e7   :  { %v1936_v30 = vrot.slane %v3679_v29, 7 }
0x17e8   :  { %1773 = vrot.lane.b32.xlu1 %v1771_v57, %s3092_s4 }
0x17e9   :  { %v1739_v51 = vpop.permute.xlu0 %1738 }
0x17ea   :  { %v1741_v3 = vmul.f32 %v2853_v35, %v1739_v51 }
0x17ec   :  { %1743 = vrot.lane.b32.xlu1 %v1741_v3, %s3092_s4 }
0x185a   :  { %v1774_v17 = vpop.permute.xlu1 %1773 }
0x185b   :  { %2705 = vmatmul.mubr.msk.f32.vlgmr.msra.gmra.mxu0 %vm241_vm2, %v1774_v17 }
0x185c   :  { %2708 = vmatpush3.msra.mxu0 %v3339_v41  ;;  %2711 = vmatprep.mubr.msk.f32.mxu0 %vm3090_vm0, %v3089_v0 }
0x185d   :  { %2709 = vmatprep.subr.mxu0 %v3089_v0 }
0x185e   :  { %v1744_v59 = vpop.permute.xlu1 %1743  ;;  %2710 = vmatpush3.msra.mxu0 %v3346_v42 }
0x185f   :  { %v3629_v63 = vadd.f32 %v1744_v59, %v1736_v58  ;;  %1950 = vmatprep.subr.bf16.mxu0 %v3555_v23 }
0x1861   :  { %2856 = vtanh.f32 %v3629_v63 }
0x186e   :  { %v2857_v2 = vpop.eup %2856 }
0x186f   :  { %1749 = vrot.lane.b32.xlu0 %v2857_v2, %s3093_s13 }
0x1873   :  { %1930 = vrot.lane.b32.xlu0 %v1771_v57, %s3093_s13 }
0x18e1   :  { %v1750_v7 = vpop.permute.xlu0 %1749 }
0x18e2   :  { %v1752_v8 = vmul.f32 %v2853_v35, %v1750_v7  ;;  %v1935_v35 = vrot.slane %v3255_v22, 7 }
0x18e4   :  { %1927 = vrot.lane.b32.xlu1 %v1752_v8, %s3092_s4 }
0x18e5   :  { %v1931_v16 = vpop.permute.xlu0 %1930 }
0x191b   :  { %v1843_v54 = vpop.f32.mrf.mxu0 }
0x191c   :  { %v3637_v13 = vadd.f32 %v1843_v54, %v3350_v43 }
0x191d   :  { %v2706_v14 = vpop.f32.mrf.mxu0 }
0x191e   :  { %2712 = vmatmul.mubr.msk.f32.vlgmr.msra.gmra.mxu0 %vm136_vm1, %v3637_v13 }
0x191f   :  { %1951 = vmatpush1.bf16.msra.mxu0 %v3570_v6  ;;  %1974 = vmatprep.mubr.bf16.mxu0 %v3091_v1 }
0x1920   :  { %1952 = vmatprep.subr.bf16.mxu0 %v3577_v9 }
0x1923   :  { %1953 = vmatpush1.bf16.msra.mxu0 %v3583_v60 }
0x1924   :  { %1954 = vmatprep.subr.bf16.mxu0 %v3589_v61 }
0x1927   :  { %1955 = vmatpush1.bf16.msra.mxu0 %v3649_v10 }
0x1928   :  { %1956 = vmatprep.subr.bf16.mxu0 %v3655_v11 }
0x192b   :  { %1957 = vmatpush1.bf16.msra.mxu0 %v3661_v15 }
0x192c   :  { %2732 = vmatprep.subr.mxu0 %v3089_v0 }
0x1956   :  { %v1928_v18 = vpop.permute.xlu1 %1927 }
0x1957   :  { %v1933_v19 = vsel %vm241_vm2, %v1928_v18, %v1931_v16 }
0x1958   :  { %v1934_v20 = vpack.c.bf16 %v1933_v19, %v1933_v19 }
0x195a   :  { %2520 = vmatmul.mubr.msk.bf16.vlgmr.msra.gmra.mxu0 %vm284_vm3, %v1934_v20 }
0x195b   :  { %2733 = vmatpush3.msra.mxu0 %v3284_v26  ;;  %2740 = vmatprep.mubr.msk.f32.mxu0 %vm3090_vm0, %v3089_v0 }
0x195c   :  { %2734 = vmatprep.subr.mxu0 %v3089_v0 }
0x195d   :  { %2735 = vmatpush3.msra.mxu0 %v3289_v27 }
0x195e   :  { %2736 = vmatprep.subr.mxu0 %v3089_v0 }
0x195f   :  { %2737 = vmatpush3.msra.mxu0 %v3296_v28 }
0x1960   :  { %2738 = vmatprep.subr.mxu0 %v3089_v0 }
0x1961   :  { %2739 = vmatpush3.msra.mxu0 %v3307_v31 }
0x1962   :  { %2743 = vmatprep.subr.mxu0 %v3089_v0 }
0x19de   :  { %v3677_v24 = vpop.f32.mrf.mxu0 }
0x19e0   :  { %v2713_v26 = vpop.f32.mrf.mxu0 }
0x1a1a   :  { %v1976_v32 = vpop.f32.mrf.mxu0 }
0x1a1b   :  { %v1977_v49 = vadd.f32 %v1976_v32, %v1935_v35 }
0x1a1c   :  { %v1978_v25 = vpop.f32.mrf.mxu0 }
0x1a1d   :  { %v1979_v27 = vadd.f32 %v1978_v25, %v1936_v30  ;;  %v2521_v33 = vmul.f32 -1.442695, %v1977_v49 }
0x1a1e   :  { %v1980_v34 = vpop.f32.mrf.mxu0 }
0x1a1f   :  { %v2522_v46 = vmul.f32 -1.442695, %v1979_v27 }
0x1a20   :  { %v1981_v36 = vpop.f32.mrf.mxu0 }
0x1a21   :  { %2858 = vpow2.f32 %v2522_v46 }
0x1a2e   :  { %v2859_v28 = vpop.eup %2858 }
0x1a2f   :  { %v1990_v37 = vadd.f32 1.0, %v2859_v28 }
0x1a31   :  { %2860 = vrcp.f32 %v1990_v37 }
0x1a32   :  { %2862 = vpow2.f32 %v2521_v33 }
0x1a3e   :  { %v2861_v31 = vpop.eup %2860 }
0x1a3f   :  { %v2014_v38 = vmul.f32 2.0, %v2861_v31  ;;  %v2863_v52 = vpop.eup %2862  ;;  %v2016_v57 = vmul.f32 %v2861_v31, %v3615_v21 }
0x1a40   :  { %v1989_v53 = vadd.f32 1.0, %v2863_v52 }
0x1a41   :  { %v2524_v40 = vadd.f32 -1.0, %v2014_v38 }
0x1a42   :  { %2864 = vrcp.f32 %v1989_v53 }
0x1a43   :  { %2018 = vrot.lane.b32.xlu1 %v2524_v40, %s3093_s13 }
0x1a4f   :  { %v2865_v17 = vpop.eup %2864 }
0x1a50   :  { %v1995_v58 = vmul.f32 2.0, %v2865_v17  ;;  %v1997_v14 = vmul.f32 %v2865_v17, %v3629_v63 }
0x1a52   :  { %v2523_v2 = vadd.f32 -1.0, %v1995_v58 }
0x1ab5   :  { %v2019_v44 = vpop.permute.xlu1 %2018 }
0x1ab6   :  { %v2021_v47 = vmul.f32 %v2861_v31, %v2019_v44  ;;  %v232_v44 = vld [vmem:[%s3806_s10] sm:$0x1] }
0x1ab7   :  { %v1134_v35 = vadd.f32 %v3475_v55, %v232_v44  ;;  %v1656_v49 = vadd.f32 %v3608_v12, %v232_v44  ;;  %v873_v55 = vadd.f32 %v3421_v50, %v232_v44  ;;  %v1917_v50 = vadd.f32 %v3677_v24, %v232_v44 }
0x1ab8   :  { %2023 = vrot.lane.b32.xlu0 %v2021_v47, %s3092_s4  ;;  %v611_v47 = vadd.f32 %v3370_v62, %v232_v44 }
0x1b2a   :  { %v2024_v51 = vpop.permute.xlu0 %2023 }
0x1b2b   :  { %v3686_v3 = vadd.f32 %v2024_v51, %v2016_v57  ;;  %v1395_v51 = vadd.f32 %v3529_v5, %v232_v44 }
0x1b2d   :  { %2866 = vtanh.f32 %v3686_v3 }
0x1b3a   :  { %v2867_v59 = vpop.eup %2866 }
0x1b3b   :  { %2029 = vrot.lane.b32.xlu1 %v2867_v59, %s3093_s13 }
0x1b3f   :  { %1999 = vrot.lane.b32.xlu1 %v2523_v2, %s3093_s13  ;;  %v2886_v2 = vld [vmem:[%s3805_s9] sm:$0xff] }
0x1bad   :  { %v2030_v22 = vpop.permute.xlu1 %2029 }
0x1bae   :  { %v2032_v7 = vmul.f32 %v2861_v31, %v2030_v22 }
0x1bb0   :  { %2034 = vrot.lane.b32.xlu0 %v2032_v7, %s3092_s4 }
0x1bb1   :  { %v2000_v8 = vpop.permute.xlu1 %1999 }
0x1bb2   :  { %v2002_v54 = vmul.f32 %v2865_v17, %v2000_v8 }
0x1bb4   :  { %2004 = vrot.lane.b32.xlu0 %v2002_v54, %s3092_s4 }
0x1c22   :  { %v2035_v21 = vpop.permute.xlu0 %2034 }
0x1c23   :  { %2723 = vmatmul.mubr.msk.f32.vlgmr.msra.gmra.mxu1 %vm241_vm2, %v2035_v21 }
0x1c24   :  { %2726 = vmatpush3.msra.mxu1 %v3339_v41  ;;  %2729 = vmatprep.mubr.msk.f32.mxu1 %vm3090_vm0, %v3089_v0 }
0x1c25   :  { %2727 = vmatprep.subr.mxu1 %v3089_v0 }
0x1c26   :  { %v2005_v16 = vpop.permute.xlu0 %2004  ;;  %2728 = vmatpush3.msra.mxu1 %v3346_v42 }
0x1c27   :  { %v3700_v18 = vadd.f32 %v2005_v16, %v1997_v14  ;;  %2207 = vmatprep.subr.bf16.mxu1 %v3555_v23  ;;  %v2887_v14 = vld [vmem:[#allocation13] sm:$0x1] }
0x1c29   :  { %2868 = vtanh.f32 %v3700_v18 }
0x1c36   :  { %v2869_v19 = vpop.eup %2868 }
0x1c37   :  { %2010 = vrot.lane.b32.xlu1 %v2869_v19, %s3093_s13 }
0x1c3b   :  { %2191 = vrot.lane.b32.xlu1 %v2032_v7, %s3093_s13 }
0x1ca9   :  { %v2011_v41 = vpop.permute.xlu1 %2010 }
0x1caa   :  { %v2013_v20 = vmul.f32 %v2865_v17, %v2011_v41 }
0x1cac   :  { %2188 = vrot.lane.b32.xlu0 %v2013_v20, %s3092_s4 }
0x1ce3   :  { %v2104_v63 = vpop.f32.mrf.mxu1 }
0x1ce4   :  { %v3708_v26 = vadd.f32 %v2104_v63, %v3350_v43  ;;  %v2192_v43 = vpop.permute.xlu1 %2191 }
0x1ce5   :  { %v2724_v42 = vpop.f32.mrf.mxu1 }
0x1ce6   :  { %2730 = vmatmul.mubr.msk.f32.vlgmr.msra.gmra.mxu1 %vm136_vm1, %v3708_v26 }
0x1ce7   :  { %2208 = vmatpush1.bf16.msra.mxu1 %v3570_v6  ;;  %2231 = vmatprep.mubr.bf16.mxu1 %v3091_v1 }
0x1ce8   :  { %2209 = vmatprep.subr.bf16.mxu1 %v3577_v9 }
0x1ceb   :  { %2210 = vmatpush1.bf16.msra.mxu1 %v3583_v60 }
0x1cec   :  { %2211 = vmatprep.subr.bf16.mxu1 %v3589_v61 }
0x1cef   :  { %2212 = vmatpush1.bf16.msra.mxu1 %v3649_v10 }
0x1cf0   :  { %2213 = vmatprep.subr.bf16.mxu1 %v3655_v11 }
0x1cf3   :  { %2214 = vmatpush1.bf16.msra.mxu1 %v3661_v15 }
0x1d1e   :  { %v2189_v23 = vpop.permute.xlu0 %2188 }
0x1d1f   :  { %v2194_v30 = vsel %vm241_vm2, %v2189_v23, %v2192_v43  ;;  %2419 = vst.msk [vmem:[#allocation15] sm:$0x1] %vm2418_vm4, %v2189_v23 }
0x1d20   :  { %v2195_v1 = vpack.c.bf16 %v2194_v30, %v2194_v30 }
0x1d22   :  { %2527 = vmatmul.mubr.msk.bf16.vlgmr.msra.gmra.mxu1 %vm284_vm3, %v2195_v1 }
0x1da6   :  { %v2177_v6 = vpop.f32.mrf.mxu1 }
0x1da7   :  { %v2178_v33 = vadd.f32 %v2177_v6, %v232_v44 }
0x1da8   :  { %v2731_v9 = vpop.f32.mrf.mxu1 }
0x1de2   :  { %v2233_v60 = vpop.f32.mrf.mxu1 }
0x1de4   :  { %v2234_v61 = vpop.f32.mrf.mxu1 }
0x1de5   :  { %v2235_v10 = vadd.f32 %v3679_v29, %v2234_v61 }
0x1de6   :  { %v2236_v32 = vpop.f32.mrf.mxu1 }
0x1de7   :  { %v2528_v11 = vmul.f32 -1.442695, %v2235_v10 }
0x1de8   :  { %v2237_v25 = vpop.f32.mrf.mxu1 }
0x1de9   :  { %2870 = vpow2.f32 %v2528_v11 }
0x1df6   :  { %v2871_v15 = vpop.eup %2870 }
0x1df7   :  { %v2242_v27 = vadd.f32 1.0, %v2871_v15 }
0x1df9   :  { %2872 = vrcp.f32 %v2242_v27 }
0x1e06   :  { %v2873_v34 = vpop.eup %2872 }
0x1e07   :  { %v2245_v46 = vmul.f32 2.0, %v2873_v34  ;;  %v2247_v31 = vmul.f32 %v2873_v34, %v3686_v3 }
0x1e09   :  { %v2529_v36 = vadd.f32 -1.0, %v2245_v46 }
0x1e0b   :  { %2249 = vrot.lane.b32.xlu0 %v2529_v36, %s3093_s13 }
0x1e7d   :  { %v2250_v28 = vpop.permute.xlu0 %2249 }
0x1e7e   :  { %v2252_v37 = vmul.f32 %v2873_v34, %v2250_v28 }
0x1e80   :  { %2254 = vrot.lane.b32.xlu1 %v2252_v37, %s3092_s4 }
0x1ef2   :  { %v2255_v38 = vpop.permute.xlu1 %2254 }
0x1ef3   :  { %v3727_v29 = vadd.f32 %v2255_v38, %v2247_v31 }
0x1ef5   :  { %2874 = vtanh.f32 %v3727_v29 }
0x1f02   :  { %v2875_v40 = vpop.eup %2874 }
0x1f03   :  { %2260 = vrot.lane.b32.xlu0 %v2875_v40, %s3093_s13 }
0x1f07   :  { %615 = vrot.lane.b32.xlu0 %v611_v47, %s3094_s2 }
0x1f0b   :  { %1138 = vrot.lane.b32.xlu0 %v1134_v35, %s3094_s2 }
0x1f0f   :  { %1660 = vrot.lane.b32.xlu0 %v1656_v49, %s3094_s2 }
0x1f13   :  { %2182 = vrot.lane.b32.xlu0 %v2178_v33, %s3094_s2 }
0x1f17   :  { %2421 = vrot.lane.b32.xlu0 %v3700_v18, %s3095_s1 }
0x1f75   :  { %v2261_v52 = vpop.permute.xlu0 %2260 }
0x1f76   :  { %v2263_v62 = vmul.f32 %v2873_v34, %v2261_v52 }
0x1f78   :  { %2265 = vrot.lane.b32.xlu1 %v2263_v62, %s3092_s4 }
0x1f79   :  { %v616_v53 = vpop.permute.xlu0 %615 }
0x1f7a   :  { %v618_v12 = vsel %vm136_vm1, %v3353_v45, %v616_v53 }
0x1f7b   :  { %620 = vst.msk [vmem:[#allocation14] sm:$0x1] %vm619_vm5, %v618_v12 }
0x1f7c   :  { %877 = vrot.lane.b32.xlu1 %v873_v55, %s3094_s2 }
0x1f7d   :  { %v1139_v57 = vpop.permute.xlu0 %1138 }
0x1f7e   :  { %v1141_v3 = vsel %vm136_vm1, %v3450_v48, %v1139_v57 }
0x1f7f   :  { %1142 = vst.msk [vmem:[#allocation14 + $0x2] sm:$0x1] %vm619_vm5, %v1141_v3 }
0x1f80   :  { %1399 = vrot.lane.b32.xlu1 %v1395_v51, %s3094_s2 }
0x1f81   :  { %v1661_v17 = vpop.permute.xlu0 %1660 }
0x1f82   :  { %v1663_v45 = vsel %vm136_vm1, %v3563_v4, %v1661_v17  ;;  %v2885_v4 = vld [vmem:[%s3805_s9 + $0x8] sm:$0xff]  ;;  %s3096_s9 = smov [#allocation14]  }
0x1f83   :  { %1664 = vst.msk [vmem:[#allocation14 + $0x4] sm:$0x1] %vm619_vm5, %v1663_v45  ;;  %s2438_s7 = sshll.u32 %s3096_s9, 4  ;;  %s2439_s7 = int_to_ptr.vmem [resolvable:$true] %s2438_s7 }
0x1f84   :  { %1921 = vrot.lane.b32.xlu1 %v1917_v50, %s3094_s2  ;;  %s3028_s21 = scalar_lea.vmem %s2439_s7, 128  ;;  %p3033_p8 = scmp.lt.s32.totalorder %s2439_s7, %s2439_s7 }
0x1f85   :  { %v2183_v58 = vpop.permute.xlu0 %2182  ;;  %p3029_p7 = scmp.ne.s32.totalorder %s2439_s7, %s3028_s21  ;;  %p3034_p9 = scmp.lt.s32.totalorder %s3028_s21, %s3028_s21 }
0x1f86   :  { %v2185_v5 = vsel %vm136_vm1, %v3708_v26, %v2183_v58 }
0x1f87   :  { %2186 = vst.msk [vmem:[#allocation14 + $0x6] sm:$0x1] %vm619_vm5, %v2185_v5  ;;  %p3035_p10 = por %p3034_p9, %p3033_p8 }
0x1f89   :  { %v2422_v48 = vpop.permute.xlu0 %2421  ;;  %p3036_p11 = pnand %p3035_p10, %p3029_p7 }
0x1f8a   :  { %2424 = vst.msk [vmem:[#allocation15 + $0x2] sm:$0x1] %vm2418_vm4, %v2422_v48 }
0x1fea   :  { %v2266_v59 = vpop.permute.xlu1 %2265 }
0x1feb   :  { %2426 = vst.msk [vmem:[#allocation15 + $0x1] sm:$0x1] %vm2418_vm4, %v2266_v59  ;;  %2741 = vmatmul.mubr.msk.f32.vlgmr.msra.gmra.mxu0 %vm241_vm2, %v2266_v59 }
0x1fec   :  { %2744 = vmatpush3.msra.mxu0 %v2885_v4  ;;  %2747 = vmatprep.mubr.msk.f32.mxu0 %vm3090_vm0, %v3089_v0 }
0x1fed   :  { %2745 = vmatprep.subr.mxu0 %v3089_v0 }
0x1fee   :  { %v878_v24 = vpop.permute.xlu1 %877  ;;  %2746 = vmatpush3.msra.mxu0 %v2886_v2 }
0x1fef   :  { %v880_v22 = vsel %vm136_vm1, %v3396_v39, %v878_v24 }
0x1ff0   :  { %881 = vst.msk [vmem:[#allocation14 + $0x1] sm:$0x1] %vm619_vm5, %v880_v22 }
0x1ff2   :  { %v1400_v7 = vpop.permute.xlu1 %1399 }
0x1ff3   :  { %v1402_v8 = vsel %vm136_vm1, %v3504_v56, %v1400_v7 }
0x1ff4   :  { %1403 = vst.msk [vmem:[#allocation14 + $0x3] sm:$0x1] %vm619_vm5, %v1402_v8 }
0x1ff6   :  { %v1922_v54 = vpop.permute.xlu1 %1921 }
0x1ff7   :  { %v1924_v0 = vsel %vm136_vm1, %v3637_v13, %v1922_v54 }
0x1ff8   :  { %1925 = vst.msk [vmem:[#allocation14 + $0x5] sm:$0x1] %vm619_vm5, %v1924_v0 }
0x20ab   :  { %v2335_v21 = vpop.f32.mrf.mxu0 }
0x20ac   :  { %v2336_v16 = vadd.f32 %v2887_v14, %v2335_v21 }
0x20ad   :  { %v2742_v18 = vpop.f32.mrf.mxu0 }
0x20ae   :  { %2748 = vmatmul.mubr.msk.f32.vlgmr.msra.gmra.mxu0 %vm136_vm1, %v2336_v16 }
0x216e   :  { %v2408_v39 = vpop.f32.mrf.mxu0 }
0x216f   :  { %v2409_v19 = vadd.f32 %v2408_v39, %v232_v44 }
0x2170   :  { %v2749_v41 = vpop.f32.mrf.mxu0 }
0x2171   :  { %2413 = vrot.lane.b32.xlu1 %v2409_v19, %s3094_s2 }
0x2175   :  { %2428 = vrot.lane.b32.xlu1 %v3727_v29, %s3095_s1 }
0x21e3   :  { %v2414_v56 = vpop.permute.xlu1 %2413 }
0x21e4   :  { %v2416_v13 = vsel %vm136_vm1, %v2336_v16, %v2414_v56 }
0x21e5   :  { %2417 = vst.msk [vmem:[#allocation14 + $0x7] sm:$0x1] %vm619_vm5, %v2416_v13 }
0x21e6   :  { %3039 = shalt.err (!%p3036_p11)
}
0x21e7   :  { %2441 = dma.vmem_to_hbm [thread:$0]  %s2439_s7, 128, %s3807_s11, [#allocation4]   ;;  %v2429_v20 = vpop.permute.xlu1 %2428 }
0x21e8   :  { %2431 = vst.msk [vmem:[#allocation15 + $0x3] sm:$0x1] %vm2418_vm4, %v2429_v20  ;;  %s3048_s23 = scalar_lea.vmem %s2449_s20, 64  ;;  %p3053_p13 = scmp.lt.s32.totalorder %s2449_s20, %s2449_s20 }
0x21e9   :  { %p3049_p12 = scmp.ne.s32.totalorder %s2449_s20, %s3048_s23  ;;  %p3054_p0 = scmp.lt.s32.totalorder %s3048_s23, %s3048_s23 }
0x21eb   :  { %p3055_p1 = por %p3054_p0, %p3053_p13 }
0x21ed   :  { %p3056_p2 = pnand %p3055_p1, %p3049_p12 }
0x21ef   :  { %3059 = shalt.err (!%p3056_p2)
}
0x21f0   :  { %2451 = dma.vmem_to_hbm [thread:$0]  %s2449_s20, 64, %s3808_s12, [#allocation16]  }
0x21f1   :  { %3076 = dma.done.wait [#allocation4], 128  }
0x21f2   :  { %3077 = vsyncadd [#allocation4], 4294967168 }
0x21f3   :  { %3078 = dma.done.wait [#allocation16], 64  }
0x21f4   :  { %3079 = vsyncadd [#allocation16], 4294967232 }
0x21f5   :  { %2458 = vsyncpa [#allocation3], 1 }
0x21f6   :  { %2459 = vsyncpa [#allocation6], 1 }
0x21f7   :  { %2460 = vsyncpa [#allocation9], 1 }
0x21f8   :  { %2461 = vsyncpa [#allocation12], 1 }
0x21f9   :  { %2462 = vsyncpa [#allocation4], 1 }
0x21fa   :  { %2463 = vsyncpa [#allocation16], 1 }

</bundles_post_ra>
